<compile_context>
chip_gen: v7x
topology: tpu7x:2x2x1
jax: 0.10.0
libtpu: 0.0.40
codegen_flags: <defaults>
</compile_context>

<pallas_src>
import functools

import jax
import jax.numpy as jnp
from jax.experimental import pallas as pl
from jax.experimental.pallas import tpu as pltpu


def simple_gcn_kernel(inv_ls2,
                      oh_ref,      # (G*N, S)   bf16  one-hot atom types (stacked graphs)
                      ed2_ref,     # (G, N, N)  f32   dist^2 where edge, -1.0 sentinel otherwise
                      table_ref,   # (S, F_in)  bf16  AtomFeaturizer table
                      wf_ref,      # (F_in, D)  bf16  fused weight  W_emb @ W_gc
                      bf_ref,      # (1, D)     f32   fused bias    b_emb @ W_gc
                      bg_ref,      # (1, D)     f32   GraphConv bias
                      out_ref):    # (G, D)     f32   per-graph AvgPooling readout
    G, N, _ = ed2_ref.shape
    D = wf_ref.shape[1]

    # --- AtomFeaturizer gather as a one-hot MXU matmul, then fused Linear ---
    # x rows are exact bf16 table rows (one-hot selection), M = G*N = 128.
    x = jnp.dot(oh_ref[...], table_ref[...],
                preferred_element_type=jnp.float32)             # (G*N, F_in)
    hW = jnp.dot(x.astype(jnp.bfloat16), wf_ref[...],
                 preferred_element_type=jnp.float32)            # (G*N, D) = x @ (W_emb @ W_gc)
    h3 = hW.reshape(G, N, D)

    # --- edge weights exp(-r^2/ls^2) and DGL norm='both' (structural degrees), f32 path ---
    ed2 = ed2_ref[...]
    maskf = (ed2 >= 0.0).astype(jnp.float32)                    # adjacency mask[dst, src]
    ew = maskf * jnp.exp(-ed2 * inv_ls2)                        # zero where no edge
    out_deg = jnp.sum(maskf, axis=1, keepdims=True)             # (G, 1, N) out-degree of src
    in_deg = jnp.sum(maskf, axis=2, keepdims=True)              # (G, N, 1) in-degree of dst
    ew_n = (ew * jax.lax.rsqrt(jnp.maximum(out_deg, 1.0))
               * jax.lax.rsqrt(jnp.maximum(in_deg, 1.0)))       # D_dst^-1/2 A_w D_src^-1/2
    row_w = jnp.sum(ew_n, axis=2, keepdims=True)                # (G, N, 1) for fused bias term

    # --- aggregate, fused biases, ReLU, AvgPooling readout ---
    agg = jnp.einsum('gij,gjd->gid', ew_n, h3,
                     preferred_element_type=jnp.float32)        # (G, N, D)
    rst = (agg
           + row_w * bf_ref[...].reshape(1, 1, D)               # == ew_n @ (ones @ b_emb) @ W_gc
           + bg_ref[...].reshape(1, 1, D))                      # + b_gc
    x1 = jnp.maximum(rst, 0.0)                                  # ReLU
    out_ref[...] = jnp.mean(x1, axis=1)                         # mean over nodes -> (G, D)


def simple_gcn_forward(atom_types, atom_table, mask, dist,
                       w_emb, b_emb, w_gc, b_gc,
                       edge_lengthscale=8.0, graphs_per_step=8):
    """Batched SimpleGCN forward: B graphs, N nodes each, dense adjacency."""
    B, N = atom_types.shape
    S, F_in = atom_table.shape
    D = w_emb.shape[1]
    G = min(graphs_per_step, B)
    assert B % G == 0, "batch must be divisible by graphs_per_step"
    assert (G % 8 == 0) or (G == B), "per-step graph count must tile (8,·) sublanes"

    # Host-side algebraic fusion (exact, done once): fold the two Linear weights.
    w_fused = (w_emb @ w_gc).astype(jnp.bfloat16)               # (F_in, D)
    b_fused = (b_emb @ w_gc).astype(jnp.float32)                # (1, D)
    b_gc_f32 = b_gc.astype(jnp.float32)                         # (1, D)
    table_bf16 = atom_table.astype(jnp.bfloat16)
    # One-hot atom types (tiny: B*N x S) -> featurizer gather happens in-kernel on the MXU.
    onehot = jax.nn.one_hot(atom_types.reshape(-1), S, dtype=jnp.bfloat16)   # (B*N, S)
    # Single edge tensor: squared distance where an edge exists, -1 sentinel otherwise.
    edge_d2 = jnp.where(mask > 0, dist * dist, -1.0).astype(jnp.float32)     # (B, N, N)

    inv_ls2 = 1.0 / (float(edge_lengthscale) ** 2)
    kernel = functools.partial(simple_gcn_kernel, inv_ls2)

    flops = int(B * (2 * N * S * F_in + 2 * N * F_in * D + 2 * N * N * D))
    transcendentals = int(B * N * N + 2 * B * N)
    bytes_accessed = int(onehot.size * 2 + edge_d2.size * 4 + table_bf16.size * 2
                         + w_fused.size * 2 + (b_fused.size + b_gc.size + B * D) * 4)

    return pl.pallas_call(
        kernel,
        out_shape=jax.ShapeDtypeStruct((B, D), jnp.float32),
        grid_spec=pltpu.PrefetchScalarGridSpec(
            num_scalar_prefetch=0,
            grid=(B // G,),
            in_specs=[
                pl.BlockSpec((G * N, S), lambda b: (b, 0)),       # per-step stacked one-hot
                pl.BlockSpec((G, N, N), lambda b: (b, 0, 0)),     # per-step edge tensor
                pl.BlockSpec((S, F_in), lambda b: (0, 0)),        # VMEM-resident table
                pl.BlockSpec((F_in, D), lambda b: (0, 0)),        # VMEM-resident fused weight
                pl.BlockSpec((1, D), lambda b: (0, 0)),           # VMEM-resident fused bias
                pl.BlockSpec((1, D), lambda b: (0, 0)),           # VMEM-resident GraphConv bias
            ],
            out_specs=pl.BlockSpec((G, D), lambda b: (b, 0)),
        ),
        compiler_params=pltpu.CompilerParams(
            dimension_semantics=("parallel",)),                   # shard batch over TCs
        cost_estimate=pl.CostEstimate(
            flops=flops, transcendentals=transcendentals,
            bytes_accessed=bytes_accessed),
    )(onehot, edge_d2, table_bf16, w_fused, b_fused, b_gc_f32)


def simple_gcn_reference(atom_types, atom_table, mask, dist,
                         w_emb, b_emb, w_gc, b_gc, edge_lengthscale):
    """Pure-JAX f32 reference matching the PyTorch module (for validation only)."""
    hp = jax.lax.Precision.HIGHEST
    x = atom_table[atom_types]                                          # (B, N, F_in)
    h = jnp.einsum('bnf,fd->bnd', x, w_emb, precision=hp) + b_emb[None]
    ew = jnp.where(mask > 0,
                   jnp.exp(-(dist ** 2) / (float(edge_lengthscale) ** 2)), 0.0)
    m = (mask > 0).astype(jnp.float32)
    out_deg = jnp.maximum(jnp.sum(m, axis=1, keepdims=True), 1.0)       # (B, 1, N)
    in_deg = jnp.maximum(jnp.sum(m, axis=2, keepdims=True), 1.0)        # (B, N, 1)
    ew_n = ew * jax.lax.rsqrt(out_deg) * jax.lax.rsqrt(in_deg)
    agg = jnp.einsum('bij,bjd->bid', ew_n, h, precision=hp)
    rst = jnp.einsum('bnd,de->bne', agg, w_gc, precision=hp) + b_gc[None]
    return jnp.mean(jnp.maximum(rst, 0.0), axis=1)


if __name__ == "__main__":
    key = jax.random.PRNGKey(0)
    k_tab, k_typ, k_adj, k_dst, k_we, k_be, k_wg, k_bg = jax.random.split(key, 8)

    B = 16               # graphs per batch (amortizes weights / launch overhead)
    N = 16               # nodes per graph
    F_IN = 200           # mat2vec atom_input_features
    D = 64               # embedding_features / output_features
    N_SPECIES = 8        # synthetic AtomFeaturizer vocabulary
    EDGE_LENGTHSCALE = 8.0

    # Synthetic AtomFeaturizer table + atom types.
    # TODO(synk): real AtomFeaturizer loads mat2vec.csv; here a deterministic random table.
    atom_table = jax.random.normal(k_tab, (N_SPECIES, F_IN), dtype=jnp.float32)
    atom_types = jax.random.randint(k_typ, (B, N), 0, N_SPECIES)

    # Random directed graphs: mask[g, dst, src] = 1 for an edge src -> dst, no self loops.
    mask = (jax.random.uniform(k_adj, (B, N, N)) < 0.3).astype(jnp.float32)
    mask = mask * (1.0 - jnp.eye(N, dtype=jnp.float32))
    dist = jax.random.uniform(k_dst, (B, N, N), minval=0.5, maxval=4.0) * mask

    # Deterministic parameters (shapes from SimpleGCN.__init__).
    w_emb = 0.05 * jax.random.normal(k_we, (F_IN, D), dtype=jnp.float32)
    b_emb = 0.05 * jax.random.normal(k_be, (1, D), dtype=jnp.float32)
    w_gc = 0.05 * jax.random.normal(k_wg, (D, D), dtype=jnp.float32)
    b_gc = 0.05 * jax.random.normal(k_bg, (1, D), dtype=jnp.float32)

    out = simple_gcn_forward(atom_types, atom_table, mask, dist,
                             w_emb, b_emb, w_gc, b_gc,
                             edge_lengthscale=EDGE_LENGTHSCALE,
                             graphs_per_step=8)
    out = jax.block_until_ready(out)
    assert out.shape == (B, D) and out.dtype == jnp.float32
    assert bool(jnp.all(jnp.isfinite(out)))

    # Validate against the pure-f32 reference (tolerance covers bf16 MXU weights).
    ref = jax.block_until_ready(
        simple_gcn_reference(atom_types, atom_table, mask, dist,
                             w_emb, b_emb, w_gc, b_gc, EDGE_LENGTHSCALE))
    assert bool(jnp.allclose(out, ref, atol=1e-2, rtol=1e-2)), \
        float(jnp.max(jnp.abs(out - ref)))

    print("KERNEL_OK")
</pallas_src>

<mosaic_0001>
module attributes {stable_mosaic.version = 11 : i64} {
  func.func @simple_gcn_kernel(%arg0: i32, %arg1: memref<128x8xbf16, #tpu.memory_space<vmem>>, %arg2: memref<8x16x16xf32, #tpu.memory_space<vmem>>, %arg3: memref<8x200xbf16, #tpu.memory_space<vmem>>, %arg4: memref<200x64xbf16, #tpu.memory_space<vmem>>, %arg5: memref<1x64xf32, #tpu.memory_space<vmem>>, %arg6: memref<1x64xf32, #tpu.memory_space<vmem>>, %arg7: memref<8x64xf32, #tpu.memory_space<vmem>>) attributes {dimension_semantics = [#tpu.dimension_semantics<parallel>], iteration_bounds = array<i64: 2>, scalar_prefetch = 0 : i64, scratch_operands = 0 : i64, tpu.core_type = #tpu.core_type<tc>, window_params = [{transform_indices = @transform_0, window_bounds = array<i64: 128, 8>}, {transform_indices = @transform_1, window_bounds = array<i64: 8, 16, 16>}, {pipeline_mode = #tpu.pipeline_mode<synchronous>, transform_indices = @transform_2, window_bounds = array<i64: 8, 200>}, {pipeline_mode = #tpu.pipeline_mode<synchronous>, transform_indices = @transform_3, window_bounds = array<i64: 200, 64>}, {pipeline_mode = #tpu.pipeline_mode<synchronous>, transform_indices = @transform_4, window_bounds = array<i64: 1, 64>}, {pipeline_mode = #tpu.pipeline_mode<synchronous>, transform_indices = @transform_5, window_bounds = array<i64: 1, 64>}, {transform_indices = @transform_6, window_bounds = array<i64: 8, 64>}]} {
    %c0 = arith.constant 0 : index
    %c0_0 = arith.constant 0 : index
    %0 = vector.load %arg1[%c0, %c0_0] : memref<128x8xbf16, #tpu.memory_space<vmem>>, vector<128x8xbf16>
    %c0_1 = arith.constant 0 : index
    %c0_2 = arith.constant 0 : index
    %1 = vector.load %arg3[%c0_1, %c0_2] : memref<8x200xbf16, #tpu.memory_space<vmem>>, vector<8x200xbf16>
    %cst = arith.constant dense<0.000000e+00> : vector<128x200xf32>
    %2 = tpu.matmul %0, %1, %cst {dimension_numbers = #tpu.dot_dimension_numbers<[1], [0], [0], [1], [0, 0, 1, 1], [], []>} : vector<128x8xbf16>, vector<8x200xbf16>, vector<128x200xf32> -> vector<128x200xf32>
    %3 = arith.truncf %2 : vector<128x200xf32> to vector<128x200xbf16>
    %c0_3 = arith.constant 0 : index
    %c0_4 = arith.constant 0 : index
    %4 = vector.load %arg4[%c0_3, %c0_4] : memref<200x64xbf16, #tpu.memory_space<vmem>>, vector<200x64xbf16>
    %cst_5 = arith.constant dense<0.000000e+00> : vector<128x64xf32>
    %5 = tpu.matmul %3, %4, %cst_5 {dimension_numbers = #tpu.dot_dimension_numbers<[1], [0], [0], [1], [0, 0, 1, 1], [], []>} : vector<128x200xbf16>, vector<200x64xbf16>, vector<128x64xf32> -> vector<128x64xf32>
    %6 = vector.shape_cast %5 : vector<128x64xf32> to vector<8x16x64xf32>
    %c0_6 = arith.constant 0 : index
    %c0_7 = arith.constant 0 : index
    %c0_8 = arith.constant 0 : index
    %7 = vector.load %arg2[%c0_6, %c0_7, %c0_8] : memref<8x16x16xf32, #tpu.memory_space<vmem>>, vector<8x16x16xf32>
    %cst_9 = arith.constant 0.000000e+00 : f32
    %8 = vector.broadcast %cst_9 : f32 to vector<8x16x16xf32>
    %9 = arith.cmpf oge, %7, %8 : vector<8x16x16xf32>
    %10 = arith.extui %9 : vector<8x16x16xi1> to vector<8x16x16xi32>
    %11 = arith.sitofp %10 : vector<8x16x16xi32> to vector<8x16x16xf32>
    %cst_10 = arith.constant 0.000000e+00 : f32
    %12 = vector.broadcast %cst_10 : f32 to vector<8x16x16xf32>
    %13 = arith.subf %12, %7 : vector<8x16x16xf32>
    %cst_11 = arith.constant 1.562500e-02 : f32
    %14 = vector.broadcast %cst_11 : f32 to vector<8x16x16xf32>
    %15 = arith.mulf %13, %14 : vector<8x16x16xf32>
    %16 = math.exp %15 : vector<8x16x16xf32>
    %17 = arith.mulf %11, %16 : vector<8x16x16xf32>
    %cst_12 = arith.constant dense<0.000000e+00> : vector<8x16xf32>
    %18 = vector.multi_reduction <add>, %11, %cst_12 [1] : vector<8x16x16xf32> to vector<8x16xf32>
    %19 = vector.shape_cast %18 : vector<8x16xf32> to vector<8x1x16xf32>
    %cst_13 = arith.constant dense<0.000000e+00> : vector<8x16xf32>
    %20 = vector.multi_reduction <add>, %11, %cst_13 [2] : vector<8x16x16xf32> to vector<8x16xf32>
    %21 = vector.shape_cast %20 : vector<8x16xf32> to vector<8x16x1xf32>
    %cst_14 = arith.constant 1.000000e+00 : f32
    %22 = vector.broadcast %cst_14 : f32 to vector<8x1x16xf32>
    %23 = arith.maximumf %19, %22 : vector<8x1x16xf32>
    %24 = math.rsqrt %23 : vector<8x1x16xf32>
    %25 = vector.broadcast %24 : vector<8x1x16xf32> to vector<8x16x16xf32>
    %26 = arith.mulf %17, %25 : vector<8x16x16xf32>
    %cst_15 = arith.constant 1.000000e+00 : f32
    %27 = vector.broadcast %cst_15 : f32 to vector<8x16x1xf32>
    %28 = arith.maximumf %21, %27 : vector<8x16x1xf32>
    %29 = math.rsqrt %28 : vector<8x16x1xf32>
    %30 = vector.broadcast %29 : vector<8x16x1xf32> to vector<8x16x16xf32>
    %31 = arith.mulf %26, %30 : vector<8x16x16xf32>
    %cst_16 = arith.constant dense<0.000000e+00> : vector<8x16xf32>
    %32 = vector.multi_reduction <add>, %31, %cst_16 [2] : vector<8x16x16xf32> to vector<8x16xf32>
    %33 = vector.shape_cast %32 : vector<8x16xf32> to vector<8x16x1xf32>
    "tpu.trace_start"() <{level = 10 : i32, message = "gij,gjd->gid"}> : () -> ()
    %cst_17 = arith.constant dense<0.000000e+00> : vector<8x16x64xf32>
    %34 = tpu.matmul %31, %6, %cst_17 {dimension_numbers = #tpu.dot_dimension_numbers<[2], [1], [1], [2], [0, 0, 0, 1, 1, 2], [0], [0]>} : vector<8x16x16xf32>, vector<8x16x64xf32>, vector<8x16x64xf32> -> vector<8x16x64xf32>
    "tpu.trace_stop"() : () -> ()
    %c0_18 = arith.constant 0 : index
    %c0_19 = arith.constant 0 : index
    %35 = vector.load %arg5[%c0_18, %c0_19] : memref<1x64xf32, #tpu.memory_space<vmem>>, vector<1x64xf32>
    %36 = vector.shape_cast %35 : vector<1x64xf32> to vector<1x1x64xf32>
    %37 = vector.broadcast %33 : vector<8x16x1xf32> to vector<8x16x64xf32>
    %38 = vector.broadcast %36 : vector<1x1x64xf32> to vector<8x16x64xf32>
    %39 = arith.mulf %37, %38 : vector<8x16x64xf32>
    %40 = arith.addf %34, %39 : vector<8x16x64xf32>
    %c0_20 = arith.constant 0 : index
    %c0_21 = arith.constant 0 : index
    %41 = vector.load %arg6[%c0_20, %c0_21] : memref<1x64xf32, #tpu.memory_space<vmem>>, vector<1x64xf32>
    %42 = vector.shape_cast %41 : vector<1x64xf32> to vector<1x1x64xf32>
    %43 = vector.broadcast %42 : vector<1x1x64xf32> to vector<8x16x64xf32>
    %44 = arith.addf %40, %43 : vector<8x16x64xf32>
    %cst_22 = arith.constant 0.000000e+00 : f32
    %45 = vector.broadcast %cst_22 : f32 to vector<8x16x64xf32>
    %46 = arith.maximumf %44, %45 : vector<8x16x64xf32>
    %cst_23 = arith.constant dense<0.000000e+00> : vector<8x64xf32>
    %47 = vector.multi_reduction <add>, %46, %cst_23 [1] : vector<8x16x64xf32> to vector<8x64xf32>
    %cst_24 = arith.constant 1.600000e+01 : f32
    %48 = vector.broadcast %cst_24 : f32 to vector<8x64xf32>
    %49 = arith.divf %47, %48 : vector<8x64xf32>
    %c0_25 = arith.constant 0 : index
    %c0_26 = arith.constant 0 : index
    %50 = vector.load %arg7[%c0_25, %c0_26] : memref<8x64xf32, #tpu.memory_space<vmem>>, vector<8x64xf32>
    tpu.vector_store %arg7[%c0_25, %c0_26], %49 {strides = array<i32>} : memref<8x64xf32, #tpu.memory_space<vmem>>, vector<8x64xf32>,
    return
  }
  func.func @transform_0(%arg0: i32) -> (i32, i32) {
    %c0_i32 = arith.constant 0 : i32
    %c0_i32_0 = arith.constant 0 : i32
    return %arg0, %c0_i32 : i32, i32
  }
  func.func @transform_1(%arg0: i32) -> (i32, i32, i32) {
    %c0_i32 = arith.constant 0 : i32
    %c0_i32_0 = arith.constant 0 : i32
    %c0_i32_1 = arith.constant 0 : i32
    return %arg0, %c0_i32, %c0_i32_0 : i32, i32, i32
  }
  func.func @transform_2(%arg0: i32) -> (i32, i32) {
    %c0_i32 = arith.constant 0 : i32
    %c0_i32_0 = arith.constant 0 : i32
    %c0_i32_1 = arith.constant 0 : i32
    return %c0_i32, %c0_i32_0 : i32, i32
  }
  func.func @transform_3(%arg0: i32) -> (i32, i32) {
    %c0_i32 = arith.constant 0 : i32
    %c0_i32_0 = arith.constant 0 : i32
    %c0_i32_1 = arith.constant 0 : i32
    return %c0_i32, %c0_i32_0 : i32, i32
  }
  func.func @transform_4(%arg0: i32) -> (i32, i32) {
    %c0_i32 = arith.constant 0 : i32
    %c0_i32_0 = arith.constant 0 : i32
    %c0_i32_1 = arith.constant 0 : i32
    return %c0_i32, %c0_i32_0 : i32, i32
  }
  func.func @transform_5(%arg0: i32) -> (i32, i32) {
    %c0_i32 = arith.constant 0 : i32
    %c0_i32_0 = arith.constant 0 : i32
    %c0_i32_1 = arith.constant 0 : i32
    return %c0_i32, %c0_i32_0 : i32, i32
  }
  func.func @transform_6(%arg0: i32) -> (i32, i32) {
    %c0_i32 = arith.constant 0 : i32
    %c0_i32_0 = arith.constant 0 : i32
    return %arg0, %c0_i32 : i32, i32
  }
}

</mosaic_0001>

<bundles_post_ra>
// kernel: tpu_custom_call.1
= control target key start
LH: loop header
LB: loop body
LE: loop exit
PB: predicated region body
PF: predicated region fallthrough
CT: control target
= control target key end

     0   :  { %11 = vsyncpa [#allocation3], 0  ;;  %s3039_s0 = inlined_call_operand.vmem [shape: bf16[256,8], index: 0, kind: input, shape index: {}]   ;;  %s3040_s1 = inlined_call_operand.vmem [shape: f32[16,16,16], index: 1, kind: input, shape index: {}]   ;;  %s3041_s2 = inlined_call_operand.vmem [shape: bf16[8,200], index: 2, kind: input, shape index: {}]   ;;  %s3042_s3 = inlined_call_operand.vmem [shape: bf16[200,64], index: 3, kind: input, shape index: {}]   ;;  %s3043_s4 = inlined_call_operand.vmem [shape: f32[1,64], index: 4, kind: input, shape index: {}]   ;;  %s3044_s5 = inlined_call_operand.vmem [shape: f32[1,64], index: 5, kind: input, shape index: {}]   ;;  %s3045_s6 = inlined_call_operand.hbm [shape: f32[16,64], index: 6, kind: output, shape index: {}]  }
   0x1   :  { %13 = vsyncpa [#allocation3 + $0x1], 0  ;;  %s2485_s21 = smov 0   ;;  %s2487_s22 = smov 0  }
   0x2   :  { %s2489_s23 = smov 0   ;;  %s2491_s24 = smov 0  }
   0x3 LB: > { %s2506_s25 = sadd.s32 4294967295, %s2445_s24   ;;  %s2004_s26 = sadd.s32 4294967294, %s2445_s24   ;;  %s2445_s24 = sphi %s2491_s24, %s3051_s24   ;;  %s2441_s23 = sphi %s2489_s23, %s3050_s23   ;;  %s2437_s22 = sphi %s2487_s22, %s3049_s22   ;;  %s2433_s21 = sphi %s2485_s21, %s3048_s21  }
   0x4   : > { %s2510_s27 = sadd.s32 1, %s2445_s24   ;;  %s162_s28 = sadd.s32 1, %s2441_s23 }
   0x5   : > { %s159_s29 = ssub.s32 %s2445_s24, %s2510_s27  ;;  %p172_p0 = scmp.ne.s32.totalorder %s2441_s23, %s2437_s22 }
   0x6   : > { %p160_p1 = scmp.eq.s32.totalorder %s159_s29, 0  ;;  %p173_p2 = scmp.eq.s32.totalorder %s2506_s25, 1 }
   0x7   : > { %p178_p3 = scmp.ne.s32.totalorder %s2437_s22, %s2433_s21  ;;  %p179_p4 = scmp.eq.s32.totalorder %s2004_s26, 1 }
   0x8   : > { %s2521_s30 = scalar_select %p160_p1, %s2441_s23, %s162_s28  }
   0x9   : > { %p2523_p5 = por %p173_p2, %p172_p0  ;;  %p2527_p6 = por %p179_p4, %p178_p3 }
   0xa   : > { %p2007_p7 = scmp.ge.s32.totalorder %s2445_s24, 1  ;;  %p228_p8 = scmp.lt.s32.totalorder %s2445_s24, 3 }
   0xc   : > { %p229_p9 = pnand %p2007_p7, %p228_p8 }
   0xd   : > { %v294_v0 = vld [vmem:[%s3041_s2] sm:$0xff] (!%p229_p9)  ;;  %vm365_vm0 = vcmask (!%p229_p9), 1043456   ;;  %s2009_s11 = sshll.u32 (!%p229_p9), %s2506_s25, 4  ;;  %v2447_v4 = vmov (!%p229_p9), 0   ;;  %v2291_v6 = vld [vmem:[%s3042_s3 + $0x8] sm:$0xff] (!%p229_p9)   ;;  %vm340_vm1 = vcmask (!%p229_p9), 64512  }
   0xe   : > { %232 = sbr.rel (%p229_p9) target bundleno = 770 (0x302), region = 44  ;;  %v2290_v1 = vld [vmem:[%s3042_s3] sm:$0xff] (!%p229_p9)   ;;  %v2023_v2 = vcombine.high (!%p229_p9), %v294_v0, %v294_v0  ;;  %v2022_v3 = vcombine.low (!%p229_p9), %v294_v0, %v294_v0  ;;  %404 = vmatprep.mubr.bf16.mxu0 (!%p229_p9), %v2447_v4  ;;  %p265_p10 = scmp.lt.s32.totalorder (!%p229_p9), %s2009_s11, 31  ;;  %2213 = vmatprep.subr.bf16.mxu1 (!%p229_p9), %v2447_v4  ;;  %v2292_v8 = vld [vmem:[%s3042_s3 + $0x10] sm:$0xff] (!%p229_p9)   ;;  %v2293_v9 = vld [vmem:[%s3042_s3 + $0x18] sm:$0xff] (!%p229_p9)   ;;  %vm870_vm3 = vcmask (!%p229_p9), 130048  }
   0xf   : > { %2226 = vmatpush1.bf16.msra.mxu1 (!%p229_p9), %v2290_v1  ;;  %v2294_v11 = vld [vmem:[%s3042_s3 + $0x20] sm:$0xff] (!%p229_p9)   ;;  %v2295_v13 = vld [vmem:[%s3042_s3 + $0x28] sm:$0xff] (!%p229_p9)   ;;  %v2296_v14 = vld [vmem:[%s3042_s3 + $0x30] sm:$0xff] (!%p229_p9)   ;;  %v2448_v31 = vmov (!%p229_p9), 0.0   ;;  %s261_s28 = sand.u32 (!%p229_p9), 1, %s2437_s22   ;;  %s2089_s9 = sshll.u32 (!%p229_p9), %s2506_s25, 7 }
  0x10   : > { %2024 = vmatprep.subr.msk.bf16.mxu0 (!%p229_p9), %vm365_vm0, %v2023_v2  ;;  %v367_v5 = vsel (!%p229_p9), %vm365_vm0, %v2022_v3, 0  ;;  %2214 = vmatprep.subr.bf16.mxu1 (!%p229_p9), %v2447_v4  ;;  %v2297_v16 = vld [vmem:[%s3042_s3 + $0x38] sm:$0xff] (!%p229_p9)   ;;  %v2298_v17 = vld [vmem:[%s3042_s3 + $0x40] sm:$0xff] (!%p229_p9)   ;;  %v2299_v19 = vld [vmem:[%s3042_s3 + $0x48] sm:$0xff] (!%p229_p9)   ;;  %s2008_s29 = sshll.u32 (!%p229_p9), %s261_s28, 3  ;;  %s1920_s14 = scalar_lea.sflag (!%p229_p9), [#allocation3], %s261_s28 }
  0x11   : > { %373 = vmatpush1.bf16.msra.mxu0 (!%p229_p9), %v367_v5  ;;  %v2300_v20 = vld [vmem:[%s3042_s3 + $0x50] sm:$0xff] (!%p229_p9)   ;;  %v2301_v24 = vld [vmem:[%s3042_s3 + $0x58] sm:$0xff] (!%p229_p9)   ;;  %v2302_v25 = vld [vmem:[%s3042_s3 + $0x60] ss:$0 sps:$4 sm:$0xff] (!%p229_p9)   ;;  %s263_s10 = scalar_lea.vmem (!%p229_p9), [#allocation2], %s2008_s29 }
  0x12   : > { %629 = vmatprep.subr.bf16.mxu0 (!%p229_p9), %v2447_v4  ;;  %v627_v26 = vsel (!%p229_p9), %vm365_vm0, %v2302_v25, 0 }
  0x13   : > { %2227 = vmatpush1.bf16.msra.mxu1 (!%p229_p9), %v2291_v6 }
  0x14   : > { %2215 = vmatprep.subr.bf16.mxu1 (!%p229_p9), %v2447_v4 }
  0x15   : > { %s3053_s11 = smov (!%p265_p10, %s2009_s11), 31 }
  0x16   : > { %s2010_s16 = sshll.u32 %s3053_s11, 2  ;;  %s1933_s11 = sshll.u32 %s263_s10, 4  ;;  %s2998_s11 = int_to_ptr.vmem [resolvable:$true] %s1933_s11 }
  0x17   : > { %s2552_s19 = scalar_lea.vmem %s3039_s0, %s2010_s16  ;;  %2228 = vmatpush1.bf16.msra.mxu1 %v2292_v8  ;;  %s2383_s15 = scalar_lea.vmem %s2998_s11, 128 }
  0x18   : > { %v2282_v7 = vld [vmem:[%s2552_s19] sm:$0xff]   ;;  %2216 = vmatprep.subr.bf16.mxu1 %v2447_v4  ;;  %v2283_v10 = vld [vmem:[%s2552_s19 + $0x8] sm:$0xff]   ;;  %v2284_v12 = vld [vmem:[%s2552_s19 + $0x10] sm:$0xff]   ;;  %p2384_p12 = scmp.ne.s32.totalorder %s2998_s11, %s2383_s15 }
  0x19   : > { %2025 = vmatmul.mubr.msk.bf16.vlgmr.msra.gmra.mrb[0].mxu0 %vm340_vm1, %v2282_v7  ;;  %v2285_v15 = vld [vmem:[%s2552_s19 + $0x18] sm:$0xff]   ;;  %v2286_v18 = vld [vmem:[%s2552_s19 + $0x20] sm:$0xff]   ;;  %v2287_v21 = vld [vmem:[%s2552_s19 + $0x28] sm:$0xff]  }
  0x1a   : > { %414 = vmatprep.mubr.bf16.mxu0 %v2447_v4  ;;  %630 = vmatpush1.bf16.msra.mxu0 %v2290_v1  ;;  %v2288_v22 = vld [vmem:[%s2552_s19 + $0x30] sm:$0xff]   ;;  %v2289_v23 = vld [vmem:[%s2552_s19 + $0x38] sm:$0xff]   ;;  %s2011_s19 = sshll.u32 %s2506_s25, 3  ;;  %p2385_p13 = pnand %p2384_p12, %p2523_p5 }
  0x1b   : > { %631 = vmatprep.subr.bf16.mxu0 %v2447_v4  ;;  %2229 = vmatpush1.bf16.msra.mxu1 %v2293_v9  ;;  %p271_p11 = scmp.lt.s32.totalorder %s2011_s19, 15  ;;  %s2449_s25 = smov [#allocation2]  }
  0x1c   : > { %2217 = vmatprep.subr.bf16.mxu1 %v2447_v4  ;;  %p2386_p0 = pneg %p2385_p13 }
  0x1d   : > { %s3055_s19 = smov (!%p271_p11, %s2011_s19), 15 }
  0x1e   : > { %632 = vmatpush1.bf16.msra.mxu0 %v2291_v6  ;;  %s2092_s13 = sshll.u32 %s3055_s19, 4 }
  0x1f   : > { %633 = vmatprep.subr.bf16.mxu0 %v2447_v4  ;;  %2230 = vmatpush1.bf16.msra.mxu1 %v2294_v11  ;;  %s2638_s16 = scalar_lea.vmem %s3040_s1, %s2092_s13  ;;  %s2996_s13 = scalar_lea.hbm %s3045_s6, %s2089_s9 }
  0x20   : > { %2218 = vmatprep.subr.bf16.mxu1 %v2447_v4  ;;  %v726_v27 = vld [vmem:[%s2638_s16] sm:$0xff]  ;;  %v727_v29 = vld [vmem:[%s2638_s16 + $0x8] sm:$0xff]  ;;  %v728_v30 = vld [vmem:[%s2638_s16 + $0x10] sm:$0xff] }
  0x21   : > { %2026 = vmatmul.mubr.msk.bf16.gmra.mrb[4].mxu0 %vm340_vm1, %v2283_v10  ;;  %vm742_vm2 = vcmp.ge.f32.partialorder %v726_v27, 0.0  ;;  %v790_v28 = vsub.f32 0.0, %v726_v27  ;;  %vm743_vm4 = vcmp.ge.f32.partialorder %v727_v29, 0.0  ;;  %v791_v33 = vsub.f32 0.0, %v727_v29  ;;  %v729_v34 = vld [vmem:[%s2638_s16 + $0x18] sm:$0xff]  ;;  %v730_v39 = vld [vmem:[%s2638_s16 + $0x20] sm:$0xff] }
  0x22   : > { %424 = vmatprep.mubr.bf16.mxu0 %v2447_v4  ;;  %634 = vmatpush1.bf16.msra.mxu0 %v2292_v8  ;;  %v2644_v32 = vsel %vm742_vm2, 1.0, %v2448_v31  ;;  %vm744_vm5 = vcmp.ge.f32.partialorder %v728_v30, 0.0  ;;  %v2650_v37 = vsel %vm743_vm4, 1.0, %v2448_v31  ;;  %v792_v42 = vsub.f32 0.0, %v728_v30  ;;  %v731_v53 = vld [vmem:[%s2638_s16 + $0x28] sm:$0xff]  ;;  %v732_v61 = vld [vmem:[%s2638_s16 + $0x30] sm:$0xff] }
  0x23   : > { %635 = vmatprep.subr.bf16.mxu0 %v2447_v4  ;;  %2231 = vmatpush1.bf16.msra.mxu1 %v2295_v13  ;;  %v806_v35 = vmul.f32 0.015625, %v790_v28  ;;  %v871_v36 = vsel %vm870_vm3, %v2644_v32, 0.0  ;;  %v2653_v38 = vsel %vm744_vm5, 1.0, %v2448_v31  ;;  %v807_v40 = vmul.f32 0.015625, %v791_v33  ;;  %v733_v6 = vld [vmem:[%s2638_s16 + $0x38] sm:$0xff]  ;;  %v734_v25 = vld [vmem:[%s2638_s16 + $0x40] sm:$0xff] }
  0x24   : > { %2219 = vmatprep.subr.bf16.mxu1 %v2447_v4  ;;  %943 = vadd.xlane.f32.xlu0 %v871_v36  ;;  %v872_v41 = vsel %vm870_vm3, %v2650_v37, 0.0  ;;  %v880_v43 = vsel %vm870_vm3, %v2653_v38, 0.0  ;;  %vm745_vm6 = vcmp.ge.f32.partialorder %v729_v34, 0.0  ;;  %v793_v46 = vsub.f32 0.0, %v729_v34 }
  0x25   : > { %v822_v44 = vmul.f32 1.442695, %v806_v35  ;;  %v873_v45 = vadd.f32 %v872_v41, %v871_v36  ;;  %947 = vadd.xlane.f32.xlu1 %v880_v43  ;;  %v824_v47 = vmul.f32 1.442695, %v807_v40  ;;  %v808_v48 = vmul.f32 0.015625, %v792_v42 }
  0x26   : > { %636 = vmatpush1.bf16.msra.mxu0 %v2293_v9  ;;  %v2661_v49 = vsel %vm745_vm6, 1.0, %v2448_v31  ;;  %vm746_vm7 = vcmp.ge.f32.partialorder %v730_v39, 0.0  ;;  %v809_v51 = vmul.f32 0.015625, %v793_v46  ;;  %v794_v59 = vsub.f32 0.0, %v730_v39 }
  0x27   : > { %637 = vmatprep.subr.bf16.mxu0 %v2447_v4  ;;  %2232 = vmatpush1.bf16.msra.mxu1 %v2296_v14  ;;  %2303 = vpow2.f32 %v822_v44  ;;  %v874_v50 = vrot.slane %v873_v45, 4  ;;  %v881_v52 = vsel %vm870_vm3, %v2661_v49, 0.0  ;;  %v826_v54 = vmul.f32 1.442695, %v808_v48 }
  0x28   : > { %2220 = vmatprep.subr.bf16.mxu1 %v2447_v4  ;;  %2305 = vpow2.f32 %v824_v47  ;;  %945 = vadd.xlane.f32.xlu0 %v872_v41  ;;  %v882_v55 = vadd.f32 %v881_v52, %v880_v43  ;;  %v2667_v56 = vsel %vm746_vm7, 1.0, %v2448_v31  ;;  %v828_v58 = vmul.f32 1.442695, %v809_v51 }
  0x29   : > { %2027 = vmatmul.mubr.msk.bf16.gmra.mrb[8].mxu0 %vm340_vm1, %v2284_v12  ;;  %v875_v57 = vadd.f32 %v874_v50, %v873_v45  ;;  %949 = vadd.xlane.f32.xlu1 %v881_v52  ;;  %v889_v60 = vsel %vm870_vm3, %v2667_v56, 0.0  ;;  %2307 = vpow2.f32 %v826_v54  ;;  %vm747_vm8 = vcmp.ge.f32.partialorder %v731_v53, 0.0  ;;  %v735_v45 = vld [vmem:[%s2638_s16 + $0x48] sm:$0xff]  ;;  %v736_v50 = vld [vmem:[%s2638_s16 + $0x50] sm:$0xff] }
  0x2a   : > { %434 = vmatprep.mubr.bf16.mxu0 %v2447_v4  ;;  %638 = vmatpush1.bf16.msra.mxu0 %v2294_v11  ;;  %v883_v62 = vrot.slane %v882_v55, 4  ;;  %v795_v63 = vsub.f32 0.0, %v731_v53  ;;  %2309 = vpow2.f32 %v828_v58  ;;  %v810_v1 = vmul.f32 0.015625, %v794_v59 }
  0x2b   : > { %639 = vmatprep.subr.bf16.mxu0 %v2447_v4  ;;  %2233 = vmatpush1.bf16.msra.mxu1 %v2297_v16  ;;  %v876_v0 = vrot.slane %v875_v57, 2  ;;  %v2673_v2 = vsel %vm747_vm8, 1.0, %v2448_v31  ;;  %vm748_vm9 = vcmp.ge.f32.partialorder %v732_v61, 0.0  ;;  %vm749_vm10 = vcmp.ge.f32.partialorder %v733_v6, 0.0 }
  0x2c   : > { %2221 = vmatprep.subr.bf16.mxu1 %v2447_v4  ;;  %v884_v3 = vadd.f32 %v883_v62, %v882_v55  ;;  %951 = vadd.xlane.f32.xlu0 %v889_v60  ;;  %v890_v5 = vsel %vm870_vm3, %v2673_v2, 0.0  ;;  %v830_v8 = vmul.f32 1.442695, %v810_v1  ;;  %v2679_v10 = vsel %vm748_vm9, 1.0, %v2448_v31 }
  0x2d   : > { %v877_v7 = vadd.f32 %v876_v0, %v875_v57  ;;  %v891_v9 = vadd.f32 %v890_v5, %v889_v60  ;;  %953 = vadd.xlane.f32.xlu1 %v890_v5  ;;  %vm750_vm11 = vcmp.ge.f32.partialorder %v734_v25, 0.0  ;;  %v798_v52 = vsub.f32 0.0, %v734_v25  ;;  %v737_v0 = vld [vmem:[%s2638_s16 + $0x58] sm:$0xff] }
  0x2e   : > { %640 = vmatpush1.bf16.msra.mxu0 %v2295_v13  ;;  %v885_v11 = vrot.slane %v884_v3, 2  ;;  %v796_v13 = vsub.f32 0.0, %v732_v61  ;;  %2311 = vpow2.f32 %v830_v8  ;;  %v2703_v48 = vsel %vm750_vm11, 1.0, %v2448_v31 }
  0x2f   : > { %641 = vmatprep.subr.bf16.mxu0 %v2447_v4  ;;  %2234 = vmatpush1.bf16.msra.mxu1 %v2298_v17  ;;  %v907_v53 = vsel %vm870_vm3, %v2703_v48, 0.0  ;;  %vm751_vm12 = vcmp.ge.f32.partialorder %v735_v45, 0.0  ;;  %v799_v54 = vsub.f32 0.0, %v735_v45  ;;  %v814_v57 = vmul.f32 0.015625, %v798_v52 }
  0x30   : > { %2222 = vmatprep.subr.bf16.mxu1 %v2447_v4  ;;  %v2709_v58 = vsel %vm751_vm12, 1.0, %v2448_v31  ;;  %vm752_vm13 = vcmp.ge.f32.partialorder %v736_v50, 0.0  ;;  %vm753_vm14 = vcmp.ge.f32.partialorder %v737_v0, 0.0  ;;  %vm601_vm4 = vcmask 588800  }
  0x31   : > { %2028 = vmatmul.mubr.msk.bf16.gmra.mrb[12].mxu0 %vm340_vm1, %v2285_v15  ;;  %v878_v15 = vrot.slane %v877_v7, 1  ;;  %v815_v62 = vmul.f32 0.015625, %v799_v54  ;;  %v2721_v8 = vsel %vm752_vm13, 1.0, %v2448_v31  ;;  %vm1903_vm5 = vcmask 1041409  }
  0x32   : > { %444 = vmatprep.mubr.bf16.mxu0 %v2447_v4  ;;  %642 = vmatpush1.bf16.msra.mxu0 %v2296_v14  ;;  %v898_v14 = vsel %vm870_vm3, %v2679_v10, 0.0  ;;  %vm1905_vm6 = vcmask 1042434   ;;  %vm1907_vm7 = vcmask 1043459   ;;  %vm1909_vm8 = vcmask 1044484  }
  0x33   : > { %643 = vmatprep.subr.bf16.mxu0 %v2447_v4  ;;  %2235 = vmatpush1.bf16.msra.mxu1 %v2299_v19  ;;  %vm1911_vm9 = vcmask 1045509   ;;  %vm1915_vm11 = vcmask 1047559  }
  0x34   : > { %2223 = vmatprep.subr.bf16.mxu1 %v2447_v4  ;;  %955 = vadd.xlane.f32.xlu0 %v898_v14 }
  0x36   : > { %644 = vmatpush1.bf16.msra.mxu0 %v2297_v16  ;;  %v892_v16 = vrot.slane %v891_v9, 4 }
  0x37   : > { %645 = vmatprep.subr.bf16.mxu0 %v2447_v4  ;;  %2236 = vmatpush1.bf16.msra.mxu1 %v2300_v20 }
  0x38   : > { %2224 = vmatprep.subr.bf16.mxu1 %v2447_v4  ;;  %959 = vadd.xlane.f32.xlu0 %v907_v53 }
  0x39   : > { %2029 = vmatmul.mubr.msk.bf16.gmra.mrb[16].mxu0 %vm340_vm1, %v2286_v18  ;;  %v812_v18 = vmul.f32 0.015625, %v796_v13 }
  0x3a   : > { %454 = vmatprep.mubr.bf16.mxu0 %v2447_v4  ;;  %646 = vmatpush1.bf16.msra.mxu0 %v2298_v17  ;;  %v886_v17 = vadd.f32 %v885_v11, %v884_v3  ;;  %v916_v11 = vsel %vm870_vm3, %v2721_v8, 0.0 }
  0x3b   : > { %647 = vmatprep.subr.bf16.mxu0 %v2447_v4  ;;  %2237 = vmatpush1.bf16.msra.mxu1 %v2301_v24  ;;  %v834_v29 = vmul.f32 1.442695, %v812_v18 }
  0x3c   : > { %2225 = vmatprep.subr.bf16.mxu1 %v2447_v4  ;;  %v887_v28 = vrot.slane %v886_v17, 1  ;;  %963 = vadd.xlane.f32.xlu0 %v916_v11 }
  0x3e   : > { %648 = vmatpush1.bf16.msra.mxu0 %v2299_v19  ;;  %v2684_v19 = vsel %vm749_vm10, 1.0, %v2448_v31  ;;  %v888_v40 = vadd.f32 %v887_v28, %v886_v17  ;;  %vm1913_vm10 = vcmask 1046534  }
  0x3f   : > { %649 = vmatprep.subr.bf16.mxu0 %v2447_v4  ;;  %2238 = vmatpush1.bf16.msra.mxu1 %v627_v26 }
  0x40   : > { %v976_v46 = vmax.f32 %v888_v40, 1.0 }
  0x41   : > { %2030 = vmatmul.mubr.msk.bf16.gmra.mrb[20].mxu0 %vm340_vm1, %v2287_v21  ;;  %v879_v21 = vadd.f32 %v878_v15, %v877_v7  ;;  %v840_v7 = vmul.f32 1.442695, %v815_v62  ;;  %v738_v15 = vld [vmem:[%s2638_s16 + $0x60] sm:$0xff] }
  0x42   : > { %464 = vmatprep.mubr.bf16.mxu0 %v2447_v4  ;;  %650 = vmatpush1.bf16.msra.mxu0 %v2300_v20  ;;  %v2304_v20 = vpop.eup %2303  ;;  %vm754_vm15 = vcmp.ge.f32.partialorder %v738_v15, 0.0 }
  0x43   : > { %651 = vmatprep.subr.bf16.mxu0 %v2447_v4  ;;  %v2690_v27 = vmul.f32 %v2304_v20, %v2644_v32  ;;  %v975_v34 = vmax.f32 %v879_v21, 1.0  ;;  %v801_v20 = vsub.f32 0.0, %v737_v0 }
  0x45   : > { %v817_v28 = vmul.f32 0.015625, %v801_v20 }
  0x46   : > { %652 = vmatpush1.bf16.msra.mxu0 %v2301_v24  ;;  %v899_v24 = vsel %vm870_vm3, %v2684_v19, 0.0 }
  0x47   : > { %653 = vmatprep.subr.bf16.mxu0 %v2447_v4  ;;  %v900_v30 = vadd.f32 %v899_v24, %v898_v14  ;;  %957 = vadd.xlane.f32.xlu1 %v899_v24  ;;  %v2726_v14 = vsel %vm753_vm14, 1.0, %v2448_v31  ;;  %v844_v40 = vmul.f32 1.442695, %v817_v28 }
  0x48   : > { %v917_v24 = vsel %vm870_vm3, %v2726_v14, 0.0 }
  0x49   : > { %2031 = vmatmul.mubr.msk.bf16.gmra.mrb[24].mxu0 %vm340_vm1, %v2288_v22  ;;  %v893_v22 = vadd.f32 %v892_v16, %v891_v9  ;;  %v901_v41 = vrot.slane %v900_v30, 4 }
  0x4a   : > { %474 = vmatprep.mubr.bf16.mxu0 %v2447_v4  ;;  %654 = vmatpush1.bf16.msra.mxu0 %v627_v26  ;;  %v811_v4 = vmul.f32 0.015625, %v795_v63  ;;  %v2306_v26 = vpop.eup %2305  ;;  %v908_v63 = vsel %vm870_vm3, %v2709_v58, 0.0 }
  0x4b   : > { %v2693_v33 = vmul.f32 %v2306_v26, %v2650_v37  ;;  %v894_v35 = vrot.slane %v893_v22, 2  ;;  %v2308_v39 = vpop.eup %2307  ;;  %v902_v47 = vadd.f32 %v901_v41, %v900_v30  ;;  %v909_v5 = vadd.f32 %v908_v63, %v907_v53  ;;  %961 = vadd.xlane.f32.xlu1 %v908_v63  ;;  %v740_v41 = vld [vmem:[%s2638_s16 + $0x70] sm:$0xff] }
  0x4c   : > { %v832_v12 = vmul.f32 1.442695, %v811_v4  ;;  %v2310_v42 = vpop.eup %2309  ;;  %v2696_v32 = vmul.f32 %v2308_v39, %v2653_v38  ;;  %v838_v4 = vmul.f32 1.442695, %v814_v57 }
  0x4d   : > { %v895_v43 = vadd.f32 %v894_v35, %v893_v22  ;;  %v2700_v37 = vmul.f32 %v2310_v42, %v2661_v49  ;;  %v903_v38 = vrot.slane %v902_v47, 2  ;;  %v2312_v49 = vpop.eup %2311  ;;  %v910_v9 = vrot.slane %v909_v5, 4 }
  0x4e   : > { %2313 = vpow2.f32 %v832_v12  ;;  %v2712_v60 = vmul.f32 %v2312_v49, %v2667_v56  ;;  %v800_v56 = vsub.f32 0.0, %v736_v50  ;;  %v802_v35 = vsub.f32 0.0, %v738_v15 }
  0x4f   : > { %2315 = vpow2.f32 %v834_v29  ;;  %v896_v51 = vrot.slane %v895_v43, 1  ;;  %v904_v61 = vadd.f32 %v903_v38, %v902_v47  ;;  %v911_v18 = vadd.f32 %v910_v9, %v909_v5  ;;  %965 = vadd.xlane.f32.xlu1 %v917_v24 }
  0x50   : > { %2317 = vrsqrt.f32 %v975_v34  ;;  %v816_v13 = vmul.f32 0.015625, %v800_v56  ;;  %v918_v29 = vadd.f32 %v917_v24, %v916_v11 }
  0x51   : > { %2032 = vmatmul.mubr.msk.bf16.gmra.mrb[28].mxu0 %vm340_vm1, %v2289_v23  ;;  %v797_v23 = vsub.f32 0.0, %v733_v6  ;;  %v897_v55 = vadd.f32 %v896_v51, %v895_v43  ;;  %v905_v6 = vrot.slane %v904_v61, 1  ;;  %v912_v26 = vrot.slane %v911_v18, 2 }
  0x52   : > { %v919_v42 = vrot.slane %v918_v29, 4  ;;  %v818_v43 = vmul.f32 0.015625, %v802_v35  ;;  %vm756_vm1 = vcmp.ge.f32.partialorder %v740_v41, 0.0 }
  0x53   : > { %v813_v36 = vmul.f32 0.015625, %v797_v23  ;;  %v977_v3 = vmax.f32 %v897_v55, 1.0  ;;  %v842_v23 = vmul.f32 1.442695, %v816_v13  ;;  %v913_v39 = vadd.f32 %v912_v26, %v911_v18 }
  0x54   : > { %v846_v47 = vmul.f32 1.442695, %v818_v43  ;;  %v2068_v54 = vsel %vm756_vm1, 1.0, %v2448_v31 }
  0x55   : > { %v836_v44 = vmul.f32 1.442695, %v813_v36  ;;  %v934_v56 = vsel %vm870_vm3, %v2068_v54, 0.0 }
  0x57   : > { %2319 = vpow2.f32 %v836_v44 }
  0x58   : > { %2321 = vrsqrt.f32 %v976_v46  ;;  %v2314_v59 = vpop.eup %2313 }
  0x59   : > { %v2718_v1 = vmul.f32 %v2314_v59, %v2673_v2  ;;  %2323 = vrsqrt.f32 %v977_v3  ;;  %v2316_v12 = vpop.eup %2315  ;;  %v906_v2 = vadd.f32 %v905_v6, %v904_v61  ;;  %v804_v59 = vsub.f32 0.0, %v740_v41  ;;  %v741_v61 = vld [vmem:[%s2638_s16 + $0x78] sm:$0xff] }
  0x5a   : > { %2325 = vpow2.f32 %v838_v4  ;;  %v2729_v16 = vpop.eup %2317  ;;  %v2732_v17 = vmul.f32 %v2316_v12, %v2679_v10  ;;  %v739_v10 = vld [vmem:[%s2638_s16 + $0x68] sm:$0xff]  ;;  %vm757_vm2 = vcmp.ge.f32.partialorder %v741_v61, 0.0  ;;  %v805_v9 = vsub.f32 0.0, %v741_v61  ;;  %s2387_s16 = sshll.u32 %s2449_s25, 4  ;;  %s2388_s16 = int_to_ptr.vmem [resolvable:$false] %s2387_s16 }
  0x5b   : > { %2327 = vpow2.f32 %v840_v7  ;;  %v2736_v21 = vmul.f32 %v2729_v16, %v2693_v33  ;;  %v978_v22 = vmax.f32 %v906_v2, 1.0  ;;  %v2745_v33 = vsel %vm754_vm15, 1.0, %v2448_v31  ;;  %s2389_s17 = scalar_lea.vmem %s2388_s16, 256  ;;  %p2390_p1 = scmp.lt.s32.totalorder %s2998_s11, %s2388_s16 }
  0x5c   : > { %v925_v44 = vsel %vm870_vm3, %v2745_v33, 0.0  ;;  %vm755_vm0 = vcmp.ge.f32.partialorder %v739_v10, 0.0  ;;  %v803_v46 = vsub.f32 0.0, %v739_v10  ;;  %v820_v7 = vmul.f32 0.015625, %v804_v59  ;;  %p2391_p2 = scmp.lt.s32.totalorder %s2389_s17, %s2383_s15 }
  0x5d   : > { %2329 = vrsqrt.f32 %v978_v22  ;;  %967 = vadd.xlane.f32.xlu0 %v925_v44  ;;  %v2755_v45 = vsel %vm755_vm0, 1.0, %v2448_v31  ;;  %v2069_v2 = vsel %vm757_vm2, 1.0, %v2448_v31  ;;  %v821_v18 = vmul.f32 0.015625, %v805_v9 }
  0x5e   : > { %2331 = vpow2.f32 %v842_v23  ;;  %v926_v50 = vsel %vm870_vm3, %v2755_v45, 0.0  ;;  %v819_v53 = vmul.f32 0.015625, %v803_v46  ;;  %v935_v20 = vsel %vm870_vm3, %v2069_v2, 0.0  ;;  %p2392_p3 = por %p2391_p2, %p2390_p1 }
  0x5f   : > { %2333 = vpow2.f32 %v844_v40  ;;  %v927_v38 = vadd.f32 %v926_v50, %v925_v44  ;;  %969 = vadd.xlane.f32.xlu1 %v926_v50  ;;  %v936_v24 = vadd.f32 %v935_v20, %v934_v56  ;;  %v852_v28 = vmul.f32 1.442695, %v821_v18 }
  0x60   : > { %2335 = vpow2.f32 %v846_v47  ;;  %v848_v3 = vmul.f32 1.442695, %v819_v53  ;;  %p2393_p4 = pnand %p2392_p3, %p2386_p0 }
  0x61   : > { %v2320_v25 = vpop.eup %2319  ;;  %v928_v4 = vrot.slane %v927_v38, 4  ;;  %971 = vadd.xlane.f32.xlu0 %v934_v56  ;;  %v937_v10 = vrot.slane %v936_v24, 4 }
  0x62   : > { %v2741_v30 = vpop.eup %2321  ;;  %v861_v34 = vmul.f32 %v2320_v25, %v2684_v19  ;;  %v914_v19 = vrot.slane %v913_v39, 1 }
  0x63   : > { %v2749_v36 = vmul.f32 %v2741_v30, %v2700_v37  ;;  %v920_v37 = vadd.f32 %v919_v42, %v918_v29  ;;  %v2759_v51 = vpop.eup %2323  ;;  %973 = vadd.xlane.f32.xlu1 %v935_v20 }
  0x64   : > { %v915_v52 = vadd.f32 %v914_v19, %v913_v39  ;;  %v2326_v49 = vpop.eup %2325  ;;  %v2764_v55 = vmul.f32 %v2759_v51, %v2718_v1  ;;  %v929_v1 = vadd.f32 %v928_v4, %v927_v38  ;;  %v938_v39 = vadd.f32 %v937_v10, %v936_v24 }
  0x65   : > { %v921_v57 = vrot.slane %v920_v37, 2  ;;  %v2328_v62 = vpop.eup %2327  ;;  %v2768_v63 = vmul.f32 %v2326_v49, %v2703_v48  ;;  %v850_v48 = vmul.f32 1.442695, %v820_v7 }
  0x66   : > { %v979_v0 = vmax.f32 %v915_v52, 1.0  ;;  %v863_v5 = vmul.f32 %v2328_v62, %v2709_v58  ;;  %v930_v58 = vrot.slane %v929_v1, 2  ;;  %v939_v41 = vrot.slane %v938_v39, 2 }
  0x67   : > { %v922_v6 = vadd.f32 %v921_v57, %v920_v37  ;;  %v2772_v11 = vpop.eup %2329 }
  0x68   : > { %2337 = vrsqrt.f32 %v979_v0  ;;  %v2332_v13 = vpop.eup %2331  ;;  %v2776_v15 = vmul.f32 %v2772_v11, %v861_v34  ;;  %v931_v26 = vadd.f32 %v930_v58, %v929_v1 }
  0x69   : > { %v923_v12 = vrot.slane %v922_v6, 1  ;;  %2339 = vpow2.f32 %v848_v3  ;;  %v2780_v22 = vmul.f32 %v2332_v13, %v2721_v8  ;;  %v2334_v25 = vpop.eup %2333 }
  0x6a   : > { %2341 = vpow2.f32 %v850_v48  ;;  %v865_v31 = vmul.f32 %v2334_v25, %v2726_v14  ;;  %v932_v34 = vrot.slane %v931_v26, 1  ;;  %v2336_v35 = vpop.eup %2335  ;;  %v940_v14 = vadd.f32 %v939_v41, %v938_v39 }
  0x6b   : > { %v924_v23 = vadd.f32 %v923_v12, %v922_v6  ;;  %2343 = vpow2.f32 %v852_v28  ;;  %v2784_v40 = vmul.f32 %v2336_v35, %v2745_v33 }
  0x6c   : > { %v933_v8 = vadd.f32 %v932_v34, %v931_v26  ;;  %v941_v47 = vrot.slane %v940_v14, 1 }
  0x6d   : > { %v980_v29 = vmax.f32 %v924_v23, 1.0 }
  0x6e   : > { %v981_v43 = vmax.f32 %v933_v8, 1.0  ;;  %v942_v52 = vadd.f32 %v941_v47, %v940_v14 }
  0x6f   : > { %2345 = vrsqrt.f32 %v980_v29 }
  0x70   : > { %2347 = vrsqrt.f32 %v981_v43  ;;  %v982_v49 = vmax.f32 %v942_v52, 1.0 }
  0x72   : > { %v2786_v42 = vpop.eup %2337  ;;  %2349 = vrsqrt.f32 %v982_v49 }
  0x73   : > { %v2340_v44 = vpop.eup %2339  ;;  %v2789_v19 = vmul.f32 %v2786_v42, %v863_v5 }
  0x74   : > { %v867_v46 = vmul.f32 %v2340_v44, %v2755_v45  ;;  %v2342_v37 = vpop.eup %2341 }
  0x75   : > { %v2792_v50 = vmul.f32 %v2342_v37, %v2068_v54  ;;  %v2344_v33 = vpop.eup %2343 }
  0x76   : > { %v869_v38 = vmul.f32 %v2344_v33, %v2069_v2 }
  0x79   : > { %v2794_v53 = vpop.eup %2345 }
  0x7a   : > { %v2797_v57 = vmul.f32 %v2794_v53, %v865_v31  ;;  %v2799_v59 = vpop.eup %2347 }
  0x7b   : > { %v2802_v45 = vmul.f32 %v2799_v59, %v867_v46 }
  0x7c   : > { %v2804_v5 = vpop.eup %2349 }
  0x7d   : > { %v2808_v6 = vmul.f32 %v2804_v5, %v869_v38 }
  0xec   : > { %v406_v61 = vpop.f32.mrb[0].mxu0 }
  0xed   : > { %v408_v62 = vpop.f32.mrb[1].mxu0 }
  0xee   : > { %v410_v0 = vpop.f32.mrb[2].mxu0 }
  0xef   : > { %v485_v54 = vpack.c.bf16 %v410_v0, %v406_v61  ;;  %v412_v3 = vpop.f32.mrb[3].mxu0 }
  0xf0   : > { %v486_v4 = vpack.c.bf16 %v412_v3, %v408_v62 }
  0xf2   : > { %2046 = vmatprep.mubr.msk.bf16.mxu0 %vm601_vm4, %v486_v4 }
  0xf3   : > { %662 = vmatmul.mubr.bf16.vlgmr.msra.gmra.mrb[32].mxu0 %v485_v54 }
  0xf4   : > { %v416_v7 = vpop.f32.mrb[4].mxu0 }
  0xf5   : > { %v418_v56 = vpop.f32.mrb[5].mxu0 }
  0xf6   : > { %v420_v1 = vpop.f32.mrb[6].mxu0 }
  0xf7   : > { %v487_v9 = vpack.c.bf16 %v420_v1, %v416_v7  ;;  %v422_v12 = vpop.f32.mrb[7].mxu0  ;;  %v944_v1 = vpop.xlane.xlu0 %943 }
  0xf8   : > { %v488_v48 = vpack.c.bf16 %v422_v12, %v418_v56 }
  0xfa   : > { %2047 = vmatprep.mubr.msk.bf16.mxu1 %vm601_vm4, %v488_v48  ;;  %v991_v48 = vmul.f32 %v2729_v16, %v2690_v27 }
  0xfb   : > { %670 = vmatmul.mubr.bf16.vlgmr.msra.gmra.mrb[0].mxu1 %v487_v9  ;;  %v1007_v9 = vmax.f32 %v944_v1, 1.0  ;;  %v1001_v1 = vmul.f32 %v2794_v53, %v2780_v22 }
  0xfc   : > { %v426_v2 = vpop.f32.mrb[8].mxu0 }
  0xfd   : > { %v428_v13 = vpop.f32.mrb[9].mxu0  ;;  %2351 = vrsqrt.f32 %v1007_v9 }
  0xfe   : > { %v430_v58 = vpop.f32.mrb[10].mxu0 }
  0xff   : > { %v489_v18 = vpack.c.bf16 %v430_v58, %v426_v2  ;;  %v432_v20 = vpop.f32.mrb[11].mxu0  ;;  %v948_v58 = vpop.xlane.xlu1 %947 }
 0x100   : > { %v490_v23 = vpack.c.bf16 %v432_v20, %v428_v13  ;;  %v993_v13 = vmul.f32 %v2741_v30, %v2696_v32  ;;  %v1009_v20 = vmax.f32 %v948_v58, 1.0  ;;  %v997_v32 = vmul.f32 %v2772_v11, %v2732_v17 }
 0x102   : > { %2048 = vmatprep.mubr.msk.bf16.mxu1 %vm601_vm4, %v490_v23  ;;  %2353 = vrsqrt.f32 %v1009_v20 }
 0x103   : > { %678 = vmatmul.mubr.bf16.gmra.mrb[4].mxu1 %v489_v18  ;;  %v946_v18 = vpop.xlane.xlu0 %945 }
 0x104   : > { %v436_v24 = vpop.f32.mrb[12].mxu0  ;;  %v1008_v23 = vmax.f32 %v946_v18, 1.0 }
 0x105   : > { %v438_v25 = vpop.f32.mrb[13].mxu0 }
 0x106   : > { %v440_v26 = vpop.f32.mrb[14].mxu0  ;;  %2355 = vrsqrt.f32 %v1008_v23 }
 0x107   : > { %v491_v28 = vpack.c.bf16 %v440_v26, %v436_v24  ;;  %v442_v31 = vpop.f32.mrb[15].mxu0  ;;  %v2352_v12 = vpop.eup %2351 }
 0x108   : > { %v492_v29 = vpack.c.bf16 %v442_v31, %v438_v25  ;;  %v1039_v2 = vmul.f32 %v2352_v12, %v991_v48  ;;  %v950_v24 = vpop.xlane.xlu1 %949  ;;  %v995_v25 = vmul.f32 %v2759_v51, %v2712_v60 }
 0x109   : > { %v1010_v26 = vmax.f32 %v950_v24, 1.0 }
 0x10a   : > { %2049 = vmatprep.mubr.msk.bf16.mxu1 %vm601_vm4, %v492_v29  ;;  %2129 = vmatprep.mubr.msk.f32.mxu0 %vm870_vm3, %v1039_v2 }
 0x10b   : > { %686 = vmatmul.mubr.bf16.gmra.mrb[8].mxu1 %v491_v28  ;;  %v952_v28 = vpop.xlane.xlu0 %951  ;;  %2357 = vrsqrt.f32 %v1010_v26 }
 0x10c   : > { %v446_v10 = vpop.f32.mrb[16].mxu0  ;;  %v954_v31 = vpop.xlane.xlu1 %953  ;;  %v1011_v27 = vmax.f32 %v952_v28, 1.0  ;;  %v1003_v28 = vmul.f32 %v2799_v59, %v2784_v40 }
 0x10d   : > { %v448_v34 = vpop.f32.mrb[17].mxu0  ;;  %v1012_v16 = vmax.f32 %v954_v31, 1.0 }
 0x10e   : > { %v450_v35 = vpop.f32.mrb[18].mxu0  ;;  %2359 = vrsqrt.f32 %v1011_v27 }
 0x10f   : > { %v493_v39 = vpack.c.bf16 %v450_v35, %v446_v10  ;;  %v452_v8 = vpop.f32.mrb[19].mxu0  ;;  %v956_v29 = vpop.xlane.xlu0 %955  ;;  %2361 = vrsqrt.f32 %v1012_v16 }
 0x110   : > { %v494_v41 = vpack.c.bf16 %v452_v8, %v448_v34  ;;  %v958_v10 = vpop.xlane.xlu1 %957  ;;  %v1013_v30 = vmax.f32 %v956_v29, 1.0 }
 0x111   : > { %v1014_v34 = vmax.f32 %v958_v10, 1.0 }
 0x112   : > { %2050 = vmatprep.mubr.msk.bf16.mxu1 %vm601_vm4, %v494_v41  ;;  %2363 = vrsqrt.f32 %v1013_v30  ;;  %v1055_v41 = vsel %vm870_vm3, %v1039_v2, 0.0 }
 0x113   : > { %694 = vmatmul.mubr.bf16.gmra.mrb[12].mxu1 %v493_v39  ;;  %v960_v35 = vpop.xlane.xlu0 %959  ;;  %v2354_v39 = vpop.eup %2353  ;;  %2365 = vrsqrt.f32 %v1014_v34  ;;  %1056 = vadd.xlane.f32.xlu0 %v1055_v41 }
 0x114   : > { %v456_v43 = vpop.f32.mrb[20].mxu0  ;;  %v962_v60 = vpop.xlane.xlu1 %961  ;;  %v1015_v8 = vmax.f32 %v960_v35, 1.0  ;;  %v2830_v17 = vmul.f32 %v2354_v39, %v993_v13 }
 0x115   : > { %v458_v44 = vpop.f32.mrb[21].mxu0  ;;  %v2356_v51 = vpop.eup %2355 }
 0x116   : > { %v460_v14 = vpop.f32.mrb[22].mxu0  ;;  %2367 = vrsqrt.f32 %v1015_v8 }
 0x117   : > { %v495_v46 = vpack.c.bf16 %v460_v14, %v456_v43  ;;  %v462_v37 = vpop.f32.mrb[23].mxu0  ;;  %v1016_v43 = vmax.f32 %v962_v60, 1.0  ;;  %v2828_v14 = vmul.f32 %v2356_v51, %v2736_v21 }
 0x118   : > { %v496_v47 = vpack.c.bf16 %v462_v37, %v458_v44  ;;  %v964_v44 = vpop.xlane.xlu0 %963  ;;  %v966_v11 = vpop.xlane.xlu1 %965  ;;  %v999_v37 = vmul.f32 %v2786_v42, %v2768_v63 }
 0x119   : > { %2369 = vrsqrt.f32 %v1016_v43 }
 0x11a   : > { %2051 = vmatprep.mubr.msk.bf16.mxu1 %vm601_vm4, %v496_v47  ;;  %v1017_v47 = vmax.f32 %v964_v44, 1.0 }
 0x11b   : > { %702 = vmatmul.mubr.bf16.gmra.mrb[16].mxu1 %v495_v46  ;;  %v2358_v46 = vpop.eup %2357 }
 0x11c   : > { %v466_v52 = vpop.f32.mrb[24].mxu0  ;;  %v968_v21 = vpop.xlane.xlu0 %967  ;;  %2371 = vrsqrt.f32 %v1017_v47 }
 0x11d   : > { %v468_v33 = vpop.f32.mrb[25].mxu0  ;;  %v1019_v63 = vmax.f32 %v968_v21, 1.0 }
 0x11e   : > { %v470_v38 = vpop.f32.mrb[26].mxu0 }
 0x11f   : > { %v497_v49 = vpack.c.bf16 %v470_v38, %v466_v52  ;;  %v472_v61 = vpop.f32.mrb[27].mxu0  ;;  %v1058_v52 = vsel %vm870_vm3, %v2828_v14, 0.0  ;;  %v1018_v38 = vmax.f32 %v966_v11, 1.0 }
 0x120   : > { %v498_v62 = vpack.c.bf16 %v472_v61, %v468_v33  ;;  %v1061_v33 = vsel %vm870_vm3, %v2830_v17, 0.0  ;;  %1059 = vadd.xlane.f32.xlu1 %v1058_v52  ;;  %v2839_v61 = vmul.f32 %v2358_v46, %v2749_v36  ;;  %v972_v48 = vpop.xlane.xlu0 %971 }
 0x121   : > { %1062 = vadd.xlane.f32.xlu0 %v1061_v33  ;;  %2373 = vrsqrt.f32 %v1018_v38  ;;  %v1021_v13 = vmax.f32 %v972_v48, 1.0 }
 0x122   : > { %2052 = vmatprep.mubr.msk.bf16.mxu1 %vm601_vm4, %v498_v62  ;;  %v1064_v42 = vsel %vm870_vm3, %v2839_v61, 0.0  ;;  %2375 = vrsqrt.f32 %v1019_v63 }
 0x123   : > { %710 = vmatmul.mubr.bf16.gmra.mrb[20].mxu1 %v497_v49  ;;  %v2360_v49 = vpop.eup %2359 }
 0x124   : > { %v476_v0 = vpop.f32.mrb[28].mxu0  ;;  %v2362_v62 = vpop.eup %2361  ;;  %1065 = vadd.xlane.f32.xlu1 %v1064_v42 }
 0x125   : > { %v478_v54 = vpop.f32.mrb[29].mxu0 }
 0x126   : > { %v480_v3 = vpop.f32.mrb[30].mxu0 }
 0x127   : > { %v499_v4 = vpack.c.bf16 %v480_v3, %v476_v0  ;;  %v482_v7 = vpop.f32.mrb[31].mxu0  ;;  %v970_v0 = vpop.xlane.xlu1 %969 }
 0x128   : > { %v500_v56 = vpack.c.bf16 %v482_v7, %v478_v54  ;;  %v2843_v54 = vmul.f32 %v2360_v49, %v995_v25  ;;  %v1020_v3 = vmax.f32 %v970_v0, 1.0  ;;  %v2846_v7 = vmul.f32 %v2362_v62, %v2764_v55 }
 0x12a   : > { %2053 = vmatprep.mubr.msk.bf16.mxu1 %vm601_vm4, %v500_v56  ;;  %v1067_v36 = vsel %vm870_vm3, %v2843_v54, 0.0  ;;  %v1070_v9 = vsel %vm870_vm3, %v2846_v7, 0.0  ;;  %2377 = vrsqrt.f32 %v1020_v3 }
 0x12b   : > { %718 = vmatmul.mubr.bf16.gmra.mrb[24].mxu1 %v499_v4  ;;  %v2364_v4 = vpop.eup %2363  ;;  %1068 = vadd.xlane.f32.xlu0 %v1067_v36  ;;  %v974_v18 = vpop.xlane.xlu1 %973  ;;  %2379 = vrsqrt.f32 %v1021_v13 }
 0x12c   : > { %v2366_v56 = vpop.eup %2365  ;;  %v2854_v12 = vmul.f32 %v2364_v4, %v997_v32  ;;  %1071 = vadd.xlane.f32.xlu1 %v1070_v9  ;;  %v1022_v53 = vmax.f32 %v974_v18, 1.0 }
 0x12d   : > { %v2368_v2 = vpop.eup %2367  ;;  %v2857_v55 = vmul.f32 %v2366_v56, %v2776_v15 }
 0x12e   : > { %v2370_v58 = vpop.eup %2369  ;;  %v1073_v22 = vsel %vm870_vm3, %v2854_v12, 0.0  ;;  %v2863_v23 = vmul.f32 %v2368_v2, %v999_v37  ;;  %2381 = vrsqrt.f32 %v1022_v53 }
 0x12f   : > { %1074 = vadd.xlane.f32.xlu0 %v1073_v22  ;;  %v1076_v20 = vsel %vm870_vm3, %v2857_v55, 0.0  ;;  %v2372_v24 = vpop.eup %2371  ;;  %v2866_v25 = vmul.f32 %v2370_v58, %v2789_v19 }
 0x130   : > { %1077 = vadd.xlane.f32.xlu1 %v1076_v20  ;;  %v2374_v15 = vpop.eup %2373  ;;  %v1079_v26 = vsel %vm870_vm3, %v2863_v23, 0.0  ;;  %v2874_v27 = vmul.f32 %v2372_v24, %v1001_v1  ;;  %v2936_v24 = vld [vmem:[%s3043_s4] ss:$0 sm:$0xff] }
 0x131   : > { %v1082_v31 = vsel %vm870_vm3, %v2866_v25, 0.0  ;;  %v2376_v16 = vpop.eup %2375  ;;  %v2877_v29 = vmul.f32 %v2374_v15, %v2797_v57  ;;  %v1005_v57 = vmul.f32 %v2804_v5, %v2792_v50 }
 0x132   : > { %v1085_v10 = vsel %vm870_vm3, %v2874_v27, 0.0  ;;  %v2883_v40 = vmul.f32 %v2376_v16, %v1003_v28 }
 0x133   : > { %1080 = vadd.xlane.f32.xlu0 %v1079_v26  ;;  %v1088_v32 = vsel %vm870_vm3, %v2877_v29, 0.0 }
 0x134   : > { %1083 = vadd.xlane.f32.xlu1 %v1082_v31  ;;  %v2378_v19 = vpop.eup %2377  ;;  %v1091_v34 = vsel %vm870_vm3, %v2883_v40, 0.0  ;;  %v2943_v31 = vld [vmem:[%s3044_s5] ss:$0 sm:$0xff] }
 0x135   : > { %v2380_v59 = vpop.eup %2379  ;;  %v2886_v30 = vmul.f32 %v2378_v19, %v2802_v45 }
 0x136   : > { %v2894_v60 = vmul.f32 %v2380_v59, %v1005_v57 }
 0x137   : > { %1086 = vadd.xlane.f32.xlu0 %v1085_v10  ;;  %v1094_v39 = vsel %vm870_vm3, %v2886_v30, 0.0 }
 0x138   : > { %1089 = vadd.xlane.f32.xlu1 %v1088_v32  ;;  %v2382_v35 = vpop.eup %2381  ;;  %v1097_v45 = vsel %vm870_vm3, %v2894_v60, 0.0 }
 0x139   : > { %v2897_v51 = vmul.f32 %v2382_v35, %v2808_v6 }
 0x13b   : > { %1092 = vadd.xlane.f32.xlu0 %v1091_v34  ;;  %v1100_v8 = vsel %vm870_vm3, %v2897_v51, 0.0 }
 0x13c   : > { %1095 = vadd.xlane.f32.xlu1 %v1094_v39 }
 0x13f   : > { %1098 = vadd.xlane.f32.xlu0 %v1097_v45 }
 0x140   : > { %1101 = vadd.xlane.f32.xlu1 %v1100_v8 }
 0x1c6   : > { %v663_v50 = vpop.f32.mrb[32].mxu0 }
 0x1c7   : > { %v665_v5 = vpop.f32.mrb[33].mxu0 }
 0x1c8   : > { %v666_v41 = vpop.f32.mrb[34].mxu0 }
 0x1c9   : > { %v2181_v43 = vpack.c.bf16 %v666_v41, %v663_v50  ;;  %v668_v44 = vpop.f32.mrb[35].mxu0 }
 0x1cb   : > { %2182 = vmatprep.subr.bf16.mxu0 %v2181_v43 }
 0x1cc   : > { %2184 = vmatpush3.bf16.msra.mxu0 %v2181_v43 }
 0x1ce   : > { %v671_v11 = vpop.f32.mrb[0].mxu1 }
 0x1cf   : > { %v673_v46 = vpop.f32.mrb[1].mxu1  ;;  %2130 = vmatmul.mubr.msk.f32.vlgmr.msra.gmra.mrb[36].mxu0 %vm870_vm3, %v2828_v14 }
 0x1d0   : > { %v674_v6 = vpop.f32.mrb[2].mxu1  ;;  %2136 = vmatprep.mubr.msk.f32.mxu0 %vm870_vm3, %v2830_v17 }
 0x1d1   : > { %v2185_v37 = vpack.c.bf16 %v674_v6, %v671_v11  ;;  %v676_v47 = vpop.f32.mrb[3].mxu1 }
 0x1d3   : > { %2186 = vmatprep.subr.bf16.mxu0 %v2185_v37 }
 0x1d4   : > { %2188 = vmatpush3.bf16.msra.mxu0 %v2185_v37 }
 0x1d6   : > { %v679_v52 = vpop.f32.mrb[4].mxu1 }
 0x1d7   : > { %v681_v33 = vpop.f32.mrb[5].mxu1  ;;  %2137 = vmatmul.mubr.msk.f32.vlgmr.msra.gmra.mrb[38].mxu0 %vm870_vm3, %v2839_v61 }
 0x1d8   : > { %v682_v38 = vpop.f32.mrb[6].mxu1  ;;  %2143 = vmatprep.mubr.msk.f32.mxu0 %vm870_vm3, %v2843_v54 }
 0x1d9   : > { %v2189_v21 = vpack.c.bf16 %v682_v38, %v679_v52  ;;  %v684_v49 = vpop.f32.mrb[7].mxu1 }
 0x1db   : > { %2190 = vmatprep.subr.bf16.mxu0 %v2189_v21 }
 0x1dc   : > { %2192 = vmatpush3.bf16.msra.mxu0 %v2189_v21 }
 0x1de   : > { %v687_v14 = vpop.f32.mrb[8].mxu1 }
 0x1df   : > { %v689_v62 = vpop.f32.mrb[9].mxu1  ;;  %2144 = vmatmul.mubr.msk.f32.vlgmr.msra.gmra.mrb[40].mxu0 %vm870_vm3, %v2846_v7 }
 0x1e0   : > { %v690_v17 = vpop.f32.mrb[10].mxu1  ;;  %2150 = vmatprep.mubr.msk.f32.mxu0 %vm870_vm3, %v2854_v12 }
 0x1e1   : > { %v2193_v0 = vpack.c.bf16 %v690_v17, %v687_v14  ;;  %v692_v63 = vpop.f32.mrb[11].mxu1 }
 0x1e3   : > { %2194 = vmatprep.subr.bf16.mxu0 %v2193_v0 }
 0x1e4   : > { %2196 = vmatpush3.bf16.msra.mxu0 %v2193_v0 }
 0x1e6   : > { %v695_v61 = vpop.f32.mrb[12].mxu1 }
 0x1e7   : > { %v697_v42 = vpop.f32.mrb[13].mxu1  ;;  %2151 = vmatmul.mubr.msk.f32.vlgmr.msra.gmra.mrb[42].mxu0 %vm870_vm3, %v2857_v55 }
 0x1e8   : > { %v698_v54 = vpop.f32.mrb[14].mxu1  ;;  %2157 = vmatprep.mubr.msk.f32.mxu0 %vm870_vm3, %v2863_v23  ;;  %v1060_v23 = vpop.xlane.xlu1 %1059 }
 0x1e9   : > { %v2197_v3 = vpack.c.bf16 %v698_v54, %v695_v61  ;;  %v700_v4 = vpop.f32.mrb[15].mxu1  ;;  %v1111_v15 = vmul.f32 %v2936_v24, %v1060_v23 }
 0x1eb   : > { %2198 = vmatprep.subr.bf16.mxu0 %v2197_v3 }
 0x1ec   : > { %2200 = vmatpush3.bf16.msra.mxu0 %v2197_v3  ;;  %v1066_v10 = vpop.xlane.xlu1 %1065 }
 0x1ed   : > { %v1113_v34 = vmul.f32 %v2936_v24, %v1066_v10 }
 0x1ee   : > { %v703_v7 = vpop.f32.mrb[16].mxu1 }
 0x1ef   : > { %v705_v56 = vpop.f32.mrb[17].mxu1  ;;  %2158 = vmatmul.mubr.msk.f32.vlgmr.msra.gmra.mrb[44].mxu0 %vm870_vm3, %v2866_v25  ;;  %v1057_v25 = vpop.xlane.xlu0 %1056 }
 0x1f0   : > { %v706_v36 = vpop.f32.mrb[18].mxu1  ;;  %2164 = vmatprep.mubr.msk.f32.mxu0 %vm870_vm3, %v2874_v27  ;;  %v1110_v26 = vmul.f32 %v2936_v24, %v1057_v25  ;;  %v1072_v43 = vpop.xlane.xlu1 %1071 }
 0x1f1   : > { %v2201_v1 = vpack.c.bf16 %v706_v36, %v703_v7  ;;  %v708_v9 = vpop.f32.mrb[19].mxu1  ;;  %v1115_v47 = vmul.f32 %v2936_v24, %v1072_v43 }
 0x1f3   : > { %2202 = vmatprep.subr.bf16.mxu0 %v2201_v1 }
 0x1f4   : > { %2204 = vmatpush3.bf16.msra.mxu0 %v2201_v1  ;;  %v1078_v54 = vpop.xlane.xlu1 %1077 }
 0x1f5   : > { %v1117_v1 = vmul.f32 %v2936_v24, %v1078_v54 }
 0x1f6   : > { %v711_v12 = vpop.f32.mrb[20].mxu1 }
 0x1f7   : > { %v713_v48 = vpop.f32.mrb[21].mxu1  ;;  %2165 = vmatmul.mubr.msk.f32.vlgmr.msra.gmra.mrb[46].mxu0 %vm870_vm3, %v2877_v29 }
 0x1f8   : > { %v714_v2 = vpop.f32.mrb[22].mxu1  ;;  %2171 = vmatprep.mubr.msk.f32.mxu0 %vm870_vm3, %v2883_v40  ;;  %v1063_v40 = vpop.xlane.xlu0 %1062 }
 0x1f9   : > { %v2205_v55 = vpack.c.bf16 %v714_v2, %v711_v12  ;;  %v716_v13 = vpop.f32.mrb[23].mxu1  ;;  %v1112_v35 = vmul.f32 %v2936_v24, %v1063_v40  ;;  %v1084_v23 = vpop.xlane.xlu1 %1083 }
 0x1fb   : > { %2206 = vmatprep.subr.bf16.mxu0 %v2205_v55 }
 0x1fc   : > { %2208 = vmatpush3.bf16.msra.mxu0 %v2205_v55  ;;  %v1069_v11 = vpop.xlane.xlu0 %1068 }
 0x1fd   : > { %v1114_v38 = vmul.f32 %v2936_v24, %v1069_v11 }
 0x1fe   : > { %v719_v58 = vpop.f32.mrb[24].mxu1 }
 0x1ff   : > { %v721_v18 = vpop.f32.mrb[25].mxu1  ;;  %2172 = vmatmul.mubr.msk.f32.vlgmr.msra.gmra.mrb[48].mxu0 %vm870_vm3, %v2886_v30 }
 0x200   : > { %v722_v22 = vpop.f32.mrb[26].mxu1  ;;  %2178 = vmatprep.mubr.msk.f32.mxu0 %vm870_vm3, %v2894_v60  ;;  %v1075_v4 = vpop.xlane.xlu0 %1074 }
 0x201   : > { %v2209_v53 = vpack.c.bf16 %v722_v22, %v719_v58  ;;  %v724_v20 = vpop.f32.mrb[27].mxu1  ;;  %v1116_v2 = vmul.f32 %v2936_v24, %v1075_v4 }
 0x203   : > { %2210 = vmatprep.subr.bf16.mxu0 %v2209_v53 }
 0x204   : > { %2212 = vmatpush3.bf16.msra.mxu0 %v2209_v53 }
 0x207   : > { %2179 = vmatmul.mubr.msk.f32.vlgmr.msra.gmra.mrb[50].mxu0 %vm870_vm3, %v2897_v51  ;;  %vm1813_vm3 = vcmask 523264  }
 0x2a2   : > { %v2131_v28 = vpop.f32.mrb[36].mxu0 }
 0x2a3   : > { %v1204_v27 = vadd.f32 %v2131_v28, %v1111_v15  ;;  %v1198_v16 = vpop.f32.mrb[37].mxu0 }
 0x2a4   : > { %v1199_v29 = vadd.f32 %v1198_v16, %v1110_v26  ;;  %v1081_v16 = vpop.xlane.xlu0 %1080 }
 0x2a5   : > { %v1782_v19 = vadd.f32 %v2943_v31, %v1204_v27 }
 0x2a6   : > { %v1781_v32 = vadd.f32 %v2943_v31, %v1199_v29 }
 0x2a7   : > { %v1798_v59 = vmax.f32 %v1782_v19, 0.0 }
 0x2a8   : > { %v1797_v30 = vmax.f32 %v1781_v32, 0.0  ;;  %v1119_v32 = vmul.f32 %v2936_v24, %v1084_v23 }
 0x2a9   : > { %v1815_v57 = vsel %vm1813_vm3, %v1798_v59, 0.0 }
 0x2aa   : > { %v1814_v39 = vsel %vm1813_vm3, %v1797_v30, 0.0  ;;  %v2138_v60 = vpop.f32.mrb[38].mxu0 }
 0x2ab   : > { %v1816_v51 = vadd.f32 %v1815_v57, %v1814_v39  ;;  %v1285_v45 = vadd.f32 %v2138_v60, %v1113_v34  ;;  %v1279_v8 = vpop.f32.mrb[39].mxu0 }
 0x2ac   : > { %v1280_v50 = vadd.f32 %v1279_v8, %v1112_v35  ;;  %v1118_v35 = vmul.f32 %v2936_v24, %v1081_v16 }
 0x2ad   : > { %v1817_v5 = vrot.slane %v1816_v51, 4  ;;  %v1784_v41 = vadd.f32 %v2943_v31, %v1285_v45 }
 0x2ae   : > { %v1783_v44 = vadd.f32 %v2943_v31, %v1280_v50 }
 0x2af   : > { %v1818_v46 = vadd.f32 %v1817_v5, %v1816_v51  ;;  %v1800_v6 = vmax.f32 %v1784_v41, 0.0 }
 0x2b0   : > { %v1799_v37 = vmax.f32 %v1783_v44, 0.0 }
 0x2b1   : > { %v1819_v52 = vrot.slane %v1818_v46, 2  ;;  %v1824_v33 = vsel %vm1813_vm3, %v1800_v6, 0.0 }
 0x2b2   : > { %v1823_v21 = vsel %vm1813_vm3, %v1799_v37, 0.0  ;;  %v2145_v49 = vpop.f32.mrb[40].mxu0  ;;  %v1087_v37 = vpop.xlane.xlu0 %1086 }
 0x2b3   : > { %v1825_v14 = vadd.f32 %v1824_v33, %v1823_v21  ;;  %v1366_v62 = vadd.f32 %v2145_v49, %v1115_v47  ;;  %v1360_v17 = vpop.f32.mrb[41].mxu0  ;;  %v1820_v63 = vadd.f32 %v1819_v52, %v1818_v46  ;;  %v1090_v46 = vpop.xlane.xlu1 %1089 }
 0x2b4   : > { %v1361_v0 = vadd.f32 %v1360_v17, %v1114_v38  ;;  %v1121_v21 = vmul.f32 %v2936_v24, %v1090_v46  ;;  %v1120_v17 = vmul.f32 %v2936_v24, %v1087_v37 }
 0x2b5   : > { %v1826_v61 = vrot.slane %v1825_v14, 4  ;;  %v1786_v42 = vadd.f32 %v2943_v31, %v1366_v62  ;;  %v1821_v9 = vrot.slane %v1820_v63, 1 }
 0x2b6   : > { %v1785_v3 = vadd.f32 %v2943_v31, %v1361_v0 }
 0x2b7   : > { %v1827_v7 = vadd.f32 %v1826_v61, %v1825_v14  ;;  %v1802_v56 = vmax.f32 %v1786_v42, 0.0  ;;  %v1822_v25 = vadd.f32 %v1821_v9, %v1820_v63  ;;  %v1096_v9 = vpop.xlane.xlu1 %1095 }
 0x2b8   : > { %v1801_v36 = vmax.f32 %v1785_v3, 0.0 }
 0x2b9   : > { %v1828_v12 = vrot.slane %v1827_v7, 2  ;;  %v1833_v48 = vsel %vm1813_vm3, %v1802_v56, 0.0  ;;  %v1887_v59 = vmul.f32 0.0625, %v1822_v25 }
 0x2ba   : > { %v1832_v55 = vsel %vm1813_vm3, %v1801_v36, 0.0  ;;  %v2152_v13 = vpop.f32.mrb[42].mxu0 }
 0x2bb   : > { %v1829_v58 = vadd.f32 %v1828_v12, %v1827_v7  ;;  %v1834_v18 = vadd.f32 %v1833_v48, %v1832_v55  ;;  %v1447_v22 = vadd.f32 %v2152_v13, %v1117_v1  ;;  %v1441_v53 = vpop.f32.mrb[43].mxu0  ;;  %v1093_v48 = vpop.xlane.xlu0 %1092 }
 0x2bc   : > { %v1442_v20 = vadd.f32 %v1441_v53, %v1116_v2  ;;  %v1122_v23 = vmul.f32 %v2936_v24, %v1093_v48 }
 0x2bd   : > { %v1830_v15 = vrot.slane %v1829_v58, 1  ;;  %v1835_v26 = vrot.slane %v1834_v18, 4  ;;  %v1788_v28 = vadd.f32 %v2943_v31, %v1447_v22 }
 0x2be   : > { %v1787_v27 = vadd.f32 %v2943_v31, %v1442_v20 }
 0x2bf   : > { %v1831_v29 = vadd.f32 %v1830_v15, %v1829_v58  ;;  %v1836_v19 = vadd.f32 %v1835_v26, %v1834_v18  ;;  %v1804_v10 = vmax.f32 %v1788_v28, 0.0  ;;  %v1123_v18 = vmul.f32 %v2936_v24, %v1096_v9 }
 0x2c0   : > { %v1803_v40 = vmax.f32 %v1787_v27, 0.0 }
 0x2c1   : > { %v1888_v30 = vmul.f32 0.0625, %v1831_v29  ;;  %v1837_v34 = vrot.slane %v1836_v19, 2  ;;  %v1842_v57 = vsel %vm1813_vm3, %v1804_v10, 0.0 }
 0x2c2   : > { %v1841_v39 = vsel %vm1813_vm3, %v1803_v40, 0.0  ;;  %v2159_v60 = vpop.f32.mrb[44].mxu0 }
 0x2c3   : > { %v1904_v51 = vsel %vm1903_vm5, %v1888_v30, %v1887_v59  ;;  %v1838_v45 = vadd.f32 %v1837_v34, %v1836_v19  ;;  %v1843_v8 = vadd.f32 %v1842_v57, %v1841_v39  ;;  %v1528_v50 = vadd.f32 %v2159_v60, %v1119_v32  ;;  %v1522_v5 = vpop.f32.mrb[45].mxu0  ;;  %v1102_v59 = vpop.xlane.xlu1 %1101 }
 0x2c4   : > { %v1523_v41 = vadd.f32 %v1522_v5, %v1118_v35  ;;  %v1099_v34 = vpop.xlane.xlu0 %1098 }
 0x2c5   : > { %v1839_v43 = vrot.slane %v1838_v45, 1  ;;  %v1844_v44 = vrot.slane %v1843_v8, 4  ;;  %v1790_v11 = vadd.f32 %v2943_v31, %v1528_v50  ;;  %v1124_v5 = vmul.f32 %v2936_v24, %v1099_v34 }
 0x2c6   : > { %v1789_v6 = vadd.f32 %v2943_v31, %v1523_v41 }
 0x2c7   : > { %v1840_v47 = vadd.f32 %v1839_v43, %v1838_v45  ;;  %v1845_v52 = vadd.f32 %v1844_v44, %v1843_v8  ;;  %v1806_v33 = vmax.f32 %v1790_v11, 0.0 }
 0x2c8   : > { %v1805_v38 = vmax.f32 %v1789_v6, 0.0 }
 0x2c9   : > { %v1889_v49 = vmul.f32 0.0625, %v1840_v47  ;;  %v1846_v14 = vrot.slane %v1845_v52, 2  ;;  %v1851_v62 = vsel %vm1813_vm3, %v1806_v33, 0.0 }
 0x2ca   : > { %v1850_v0 = vsel %vm1813_vm3, %v1805_v38, 0.0  ;;  %v2166_v63 = vpop.f32.mrb[46].mxu0 }
 0x2cb   : > { %v1847_v61 = vadd.f32 %v1846_v14, %v1845_v52  ;;  %v1852_v42 = vadd.f32 %v1851_v62, %v1850_v0  ;;  %v1609_v54 = vadd.f32 %v2166_v63, %v1121_v21  ;;  %v1603_v3 = vpop.f32.mrb[47].mxu0  ;;  %v1906_v4 = vsel %vm1905_vm6, %v1889_v49, %v1904_v51 }
 0x2cc   : > { %v1604_v7 = vadd.f32 %v1603_v3, %v1120_v17  ;;  %v1125_v51 = vmul.f32 %v2936_v24, %v1102_v59 }
 0x2cd   : > { %v1848_v56 = vrot.slane %v1847_v61, 1  ;;  %v1853_v36 = vrot.slane %v1852_v42, 4  ;;  %v1792_v1 = vadd.f32 %v2943_v31, %v1609_v54 }
 0x2ce   : > { %v1791_v12 = vadd.f32 %v2943_v31, %v1604_v7 }
 0x2cf   : > { %v1849_v2 = vadd.f32 %v1848_v56, %v1847_v61  ;;  %v1854_v55 = vadd.f32 %v1853_v36, %v1852_v42  ;;  %v1808_v13 = vmax.f32 %v1792_v1, 0.0 }
 0x2d0   : > { %v1807_v58 = vmax.f32 %v1791_v12, 0.0 }
 0x2d1   : > { %v1890_v22 = vmul.f32 0.0625, %v1849_v2  ;;  %v1855_v53 = vrot.slane %v1854_v55, 2  ;;  %v1860_v20 = vsel %vm1813_vm3, %v1808_v13, 0.0 }
 0x2d2   : > { %v1859_v25 = vsel %vm1813_vm3, %v1807_v58, 0.0  ;;  %v2173_v15 = vpop.f32.mrb[48].mxu0 }
 0x2d3   : > { %v1856_v26 = vadd.f32 %v1855_v53, %v1854_v55  ;;  %v1861_v28 = vadd.f32 %v1860_v20, %v1859_v25  ;;  %v1690_v27 = vadd.f32 %v2173_v15, %v1123_v18  ;;  %v1684_v16 = vpop.f32.mrb[49].mxu0  ;;  %v1908_v29 = vsel %vm1907_vm7, %v1890_v22, %v1906_v4 }
 0x2d4   : > { %v1685_v19 = vadd.f32 %v1684_v16, %v1122_v23 }
 0x2d5   : > { %v1857_v10 = vrot.slane %v1856_v26, 1  ;;  %v1862_v32 = vrot.slane %v1861_v28, 4  ;;  %v1794_v40 = vadd.f32 %v2943_v31, %v1690_v27 }
 0x2d6   : > { %v1793_v30 = vadd.f32 %v2943_v31, %v1685_v19 }
 0x2d7   : > { %v1858_v57 = vadd.f32 %v1857_v10, %v1856_v26  ;;  %v1863_v35 = vadd.f32 %v1862_v32, %v1861_v28  ;;  %v1810_v39 = vmax.f32 %v1794_v40, 0.0 }
 0x2d8   : > { %v1809_v60 = vmax.f32 %v1793_v30, 0.0 }
 0x2d9   : > { %v1891_v45 = vmul.f32 0.0625, %v1858_v57  ;;  %v1864_v8 = vrot.slane %v1863_v35, 2  ;;  %v1869_v50 = vsel %vm1813_vm3, %v1810_v39, 0.0 }
 0x2da   : > { %v1868_v41 = vsel %vm1813_vm3, %v1809_v60, 0.0  ;;  %v2180_v43 = vpop.f32.mrb[50].mxu0 }
 0x2db   : > { %v1865_v44 = vadd.f32 %v1864_v8, %v1863_v35  ;;  %v1870_v11 = vadd.f32 %v1869_v50, %v1868_v41  ;;  %v1771_v46 = vadd.f32 %v2180_v43, %v1125_v51  ;;  %v1765_v6 = vpop.f32.mrb[51].mxu0  ;;  %v1910_v37 = vsel %vm1909_vm8, %v1891_v45, %v1908_v29 }
 0x2dc   : > { %v1766_v47 = vadd.f32 %v1765_v6, %v1124_v5 }
 0x2dd   : > { %v1866_v52 = vrot.slane %v1865_v44, 1  ;;  %v1871_v33 = vrot.slane %v1870_v11, 4  ;;  %v1796_v38 = vadd.f32 %v2943_v31, %v1771_v46 }
 0x2de   : > { %v1795_v21 = vadd.f32 %v2943_v31, %v1766_v47 }
 0x2df   : > { %v1867_v49 = vadd.f32 %v1866_v52, %v1865_v44  ;;  %v1872_v14 = vadd.f32 %v1871_v33, %v1870_v11  ;;  %v1812_v62 = vmax.f32 %v1796_v38, 0.0 }
 0x2e0   : > { %v1811_v24 = vmax.f32 %v1795_v21, 0.0 }
 0x2e1   : > { %v1892_v17 = vmul.f32 0.0625, %v1867_v49  ;;  %v1873_v0 = vrot.slane %v1872_v14, 2  ;;  %v1878_v63 = vsel %vm1813_vm3, %v1812_v62, 0.0 }
 0x2e2   : > { %v1877_v61 = vsel %vm1813_vm3, %v1811_v24, 0.0 }
 0x2e3   : > { %v1874_v42 = vadd.f32 %v1873_v0, %v1872_v14  ;;  %v1879_v54 = vadd.f32 %v1878_v63, %v1877_v61  ;;  %v1912_v3 = vsel %vm1911_vm9, %v1892_v17, %v1910_v37 }
 0x2e5   : > { %v1875_v4 = vrot.slane %v1874_v42, 1  ;;  %v1880_v7 = vrot.slane %v1879_v54, 4 }
 0x2e7   : > { %v1876_v56 = vadd.f32 %v1875_v4, %v1874_v42  ;;  %v1881_v31 = vadd.f32 %v1880_v7, %v1879_v54 }
 0x2e9   : > { %v1882_v36 = vrot.slane %v1881_v31, 2  ;;  %v1893_v1 = vmul.f32 0.0625, %v1876_v56 }
 0x2eb   : > { %v1883_v9 = vadd.f32 %v1882_v36, %v1881_v31  ;;  %v1914_v12 = vsel %vm1913_vm10, %v1893_v1, %v1912_v3 }
 0x2ed   : > { %v1884_v48 = vrot.slane %v1883_v9, 1 }
 0x2ef   : > { %v1885_v2 = vadd.f32 %v1884_v48, %v1883_v9 }
 0x2f1   : > { %v1894_v55 = vmul.f32 0.0625, %v1885_v2 }
 0x2f3   : > { %v1916_v13 = vsel %vm1915_vm11, %v1894_v55, %v1914_v12 }
 0x2f4   : > { %1918 = vst.msk [vmem:[%s263_s10] sm:$0xff] %vm1813_vm3, %v1916_v13 }
 0x2f5   : > { %2396 = shalt.err (!%p2393_p4)
}
 0x2f6   : > { %s2397_s18 = scalar_lea.hbm %s2996_s13, 128  ;;  %s2401_s28 = scalar_lea.hbm %s3045_s6, 256 }
 0x2f7   : > { %p2398_p7 = scmp.ne.s32.totalorder %s2996_s13, %s2397_s18  ;;  %p2402_p10 = scmp.lt.u32.totalorder %s2996_s13, %s3045_s6 }
 0x2f8   : > { %p2403_p11 = scmp.lt.u32.totalorder %s2401_s28, %s2397_s18  ;;  %p2405_p13 = scmp.lt.u32.totalorder %s2397_s18, %s2996_s13 }
 0x2f9   : > { %p2399_p8 = pnand %p2398_p7, %p2523_p5 }
 0x2fa   : > { %p2404_p12 = por %p2403_p11, %p2402_p10 }
 0x2fb   : > { %p2400_p9 = pneg %p2399_p8 }
 0x2fc   : > { %p2406_p0 = por %p2405_p13, %p2404_p12 }
 0x2fe   : > { %p2407_p1 = pnand %p2406_p0, %p2400_p9 }
 0x300   : > { %2410 = shalt.err (!%p2407_p1)
}
 0x301   : > { %2239 = dma.vmem_to_hbm [thread:$0]  (%p2523_p5), %s2998_s11, 128, %s2996_s13, %s1920_s14  }
 0x302 PF: > { %p2245_p2 = scmp.ge.s32.totalorder %s2445_s24, 2  ;;  %s1945_s10 = sand.u32 1, %s2433_s21  }
 0x303   : > { %s1946_s12 = scalar_lea.sflag [#allocation3], %s1945_s10 }
 0x304   : > { %p2242_p3 = pnand %p2245_p2, %p2527_p6 }
 0x306   : > { %2428 = dma.done.wait (!%p2242_p3), %s1946_s12, 128  }
 0x307   : > { %2430 = vsyncadd (!%p2242_p3), %s1946_s12, 4294967168  ;;  %p16_p4 = scmp.ge.s32.totalorder %s2510_s27, 4   ;;  %s3048_s21 = smov %s2437_s22 }
 0x308   : > { %s3049_s22 = smov %s2441_s23  ;;  %s3050_s23 = smov %s2521_s30 }
 0x309   : > { %s3051_s24 = smov %s2510_s27  ;;  %18 = sbr.rel (!%p16_p4) target bundleno = 3 (0x3), region = 82 }
 0x310   :  { %1951 = vsyncpa [#allocation3], 1 }
 0x311   :  { %1953 = vsyncpa [#allocation3 + $0x1], 1 }

</bundles_post_ra>
